<compile_context>
chip_gen: v7x
topology: tpu7x:2x2x1
jax: 0.10.0
libtpu: 0.0.40
codegen_flags: <defaults>
</compile_context>

<pallas_src>
import numpy as np
import jax
import jax.numpy as jnp
from jax.experimental import pallas as pl
from jax.experimental.pallas import tpu as pltpu


# ----------------------------------------------------------------------------
# Fused forward kernel: all convs + both heads in ONE pallas_call.
# ----------------------------------------------------------------------------
def _make_fused_kernel(n_conv, batch, slope):
    """Builds the fused kernel.  Ref order (inputs, then the single output):

        p1, w1, b1                           conv 1 (pre-im2col'd patches)
        (g_l, w_l, b_l) for l = 2 .. n_conv  later convs (gather mats + tap W)
        sel, wh                              fused heads (slot select + weights)
        o                                    output [B, 1 + num_speakers]

    Activation rows are kept in (spatial, batch) order with channels on lanes,
    so every intermediate is a plain 2-D [rows, channels] value that never
    leaves VMEM/vregs.
    """

    def kernel(*refs):
        o_ref = refs[-1]
        p1_ref, w1_ref, b1_ref = refs[0], refs[1], refs[2]

        # ---- conv 1: patches @ W1 + b1, LeakyReLU --------------------------
        h = jnp.dot(p1_ref[...], w1_ref[...], preferred_element_type=jnp.float32)
        h = h + b1_ref[...]                          # b is (1, C1), broadcasts
        h = jnp.where(h > 0, h, slope * h)           # [H1*W1*B, C1]

        # ---- convs 2..n: in-kernel im2col (gather matmul) + 16 tap dots ----
        ridx = 3
        for _ in range(n_conv - 1):
            g_ref, w_ref, b_ref = refs[ridx], refs[ridx + 1], refs[ridx + 2]
            ridx += 3
            m_out = g_ref.shape[1]
            c_out = w_ref.shape[2]
            acc = jnp.zeros((m_out, c_out), jnp.float32)
            for t in range(16):                      # 4x4 kernel taps, unrolled
                # Gather matmul == strided/zero-padded patch extraction on MXU.
                tap = jnp.dot(g_ref[t], h, preferred_element_type=jnp.float32)
                acc = acc + jnp.dot(tap, w_ref[t],
                                    preferred_element_type=jnp.float32)
            acc = acc + b_ref[...]
            h = jnp.where(acc > 0, acc, slope * acc)  # [Hl*Wl*B, Cl]

        # ---- fused heads:  out[b, :] = sum_s h[s*B + b, :] @ wh[s] ---------
        sel_ref, wh_ref = refs[ridx], refs[ridx + 1]
        n_slots = wh_ref.shape[0]
        n_out = wh_ref.shape[2]
        outh = jnp.zeros((batch, n_out), jnp.float32)
        for s in range(n_slots):
            rows = jnp.dot(sel_ref[s], h, preferred_element_type=jnp.float32)
            outh = outh + jnp.dot(rows, wh_ref[s],
                                  preferred_element_type=jnp.float32)

        o_ref[...] = outh.astype(o_ref.dtype)

    return kernel


# ----------------------------------------------------------------------------
# Wrapper-side helpers (trace-time constants + first-layer im2col)
# ----------------------------------------------------------------------------
def _im2col_first_layer(x):
    """NCHW input -> im2col patches for Conv2d(k=4, s=2, p=1).

    Rows ordered (oh, ow, b); columns ordered (c, kh, kw) to match the PyTorch
    weight flattening.  Only applied once to the tiny external input; every
    later layer does its im2col inside the fused kernel.
    """
    B, C, H, W = x.shape
    OH, OW = H // 2, W // 2
    xp = jnp.pad(x, ((0, 0), (0, 0), (1, 1), (1, 1)))
    taps = []
    for kh in range(4):
        for kw in range(4):
            taps.append(xp[:, :, kh:kh + 2 * OH:2, kw:kw + 2 * OW:2])
    p = jnp.stack(taps, axis=0).reshape(4, 4, B, C, OH, OW)
    p = p.transpose(4, 5, 2, 3, 0, 1)                # [OH, OW, B, C, KH, KW]
    return p.reshape(OH * OW * B, C * 16), (OH, OW)


def _gather_mats(h_in, w_in, batch):
    """Constant 0/1 matrices G[t] (t = kh*4 + kw) so that G[t] @ h selects, for
    every output position (oh, ow) of a stride-2 / k=4 / pad=1 conv, the tap-t
    input row of h (rows ordered (ih*w_in + iw)*batch + b).  Out-of-bounds taps
    (the zero padding) are all-zero rows, so padding comes for free."""
    h_out, w_out = h_in // 2, w_in // 2
    g = np.zeros((16, h_out * w_out * batch, h_in * w_in * batch), np.float32)
    for kh in range(4):
        for kw in range(4):
            t = kh * 4 + kw
            for oh in range(h_out):
                ih = 2 * oh - 1 + kh
                if not 0 <= ih < h_in:
                    continue
                for ow in range(w_out):
                    iw = 2 * ow - 1 + kw
                    if not 0 <= iw < w_in:
                        continue
                    for b in range(batch):
                        g[t, (oh * w_out + ow) * batch + b,
                             (ih * w_in + iw) * batch + b] = 1.0
    return jnp.asarray(g)


def _slot_select_mats(n_slots, batch):
    """sel[s, b, :] is one-hot at row s*batch + b — pulls one spatial slot (for
    all batch elements) out of the flat (spatial, batch) activation rows."""
    sel = np.zeros((n_slots, batch, n_slots * batch), np.float32)
    for s in range(n_slots):
        for b in range(batch):
            sel[s, b, s * batch + b] = 1.0
    return jnp.asarray(sel)


def _full_block_spec(shape):
    nd = len(shape)
    return pl.BlockSpec(shape, lambda i: (0,) * nd)


# ----------------------------------------------------------------------------
# Discriminator forward (single fused pallas_call)
# ----------------------------------------------------------------------------
def discriminator_forward(params, x, *, slope=0.01):
    B = x.shape[0]
    convs = params["convs"]
    n_conv = len(convs)

    # --- conv 1: im2col of the tiny external input (one-time XLA work) ------
    w1, b1 = convs[0]
    patches1, (oh, ow) = _im2col_first_layer(x.astype(jnp.float32))
    inputs = [patches1,
              w1.reshape(w1.shape[0], -1).T.astype(jnp.float32),   # [Cin*16, C1]
              b1.reshape(1, -1).astype(jnp.float32)]

    # --- convs 2..n: constant gather matrices + per-tap weights -------------
    c_prev = w1.shape[0]
    for layer in range(1, n_conv):
        w, b = convs[layer]
        inputs.append(_gather_mats(oh, ow, B))                     # [16,Mout,Min]
        inputs.append(jnp.transpose(w, (2, 3, 1, 0))
                      .reshape(16, w.shape[1], w.shape[0]).astype(jnp.float32))
        inputs.append(b.reshape(1, -1).astype(jnp.float32))
        oh, ow = oh // 2, ow // 2
        c_prev = w.shape[0]

    # --- heads: concat w_dis / w_clf along Cout; per-spatial-slot weights ---
    w_dis, w_clf = params["w_dis"], params["w_clf"]
    ns = w_clf.shape[0]
    k0, k1 = w_dis.shape[2], w_dis.shape[3]
    assert (k0, k1) == (oh, ow), "head kernel must equal final feature map"
    wcat = jnp.concatenate([w_dis, w_clf], axis=0)                 # [1+NS,C,K0,K1]
    wh = (jnp.transpose(wcat, (2, 3, 1, 0))
          .reshape(k0 * k1, c_prev, 1 + ns).astype(jnp.float32))
    inputs.append(_slot_select_mats(k0 * k1, B))
    inputs.append(wh)

    out = pl.pallas_call(
        _make_fused_kernel(n_conv, B, slope),
        out_shape=jax.ShapeDtypeStruct((B, 1 + ns), jnp.float32),
        grid=(1,),
        in_specs=[_full_block_spec(a.shape) for a in inputs],
        out_specs=_full_block_spec((B, 1 + ns)),
        compiler_params=pltpu.CompilerParams(
            dimension_semantics=("arbitrary",)),
    )(*inputs)

    out_src = out[:, 0:1].reshape(B, 1, 1, 1)        # conv_dis output
    out_cls = out[:, 1:]                             # conv_clf_spks .view(B, NS)
    return out_src, out_cls


# ----------------------------------------------------------------------------
# Parameter init (matches the PyTorch module's layer structure)
# ----------------------------------------------------------------------------
def init_discriminator_params(key, input_size=(16, 16), conv_dim=8,
                              repeat_num=2, num_speakers=5):
    params = {"convs": []}
    curr_dim = 1
    next_dim = conv_dim
    for _ in range(repeat_num):
        key, kw_, kb_ = jax.random.split(key, 3)
        w = jax.random.normal(kw_, (next_dim, curr_dim, 4, 4), jnp.float32) * 0.05
        b = jax.random.normal(kb_, (next_dim,), jnp.float32) * 0.05
        params["convs"].append((w, b))
        curr_dim = next_dim
        next_dim = curr_dim * 2
    k0 = input_size[0] // (2 ** repeat_num)
    k1 = input_size[1] // (2 ** repeat_num)
    key, kd, kc = jax.random.split(key, 3)
    params["w_dis"] = jax.random.normal(kd, (1, curr_dim, k0, k1), jnp.float32) * 0.05
    params["w_clf"] = jax.random.normal(kc, (num_speakers, curr_dim, k0, k1),
                                        jnp.float32) * 0.05
    return params


# ----------------------------------------------------------------------------
# Pure-JAX reference (lax.conv) for the correctness check
# ----------------------------------------------------------------------------
def _ref_forward(params, x):
    dn = ("NCHW", "OIHW", "NCHW")
    h = x
    for (w, b) in params["convs"]:
        h = jax.lax.conv_general_dilated(h, w, (2, 2), ((1, 1), (1, 1)),
                                         dimension_numbers=dn)
        h = h + b[None, :, None, None]
        h = jnp.where(h > 0, h, 0.01 * h)
    src = jax.lax.conv_general_dilated(h, params["w_dis"], (1, 1), "VALID",
                                       dimension_numbers=dn)
    cls = jax.lax.conv_general_dilated(h, params["w_clf"], (1, 1), "VALID",
                                       dimension_numbers=dn)
    B = x.shape[0]
    return src, cls.reshape(B, cls.shape[1])


if __name__ == "__main__":
    key = jax.random.PRNGKey(0)
    key, kx = jax.random.split(key)

    # Small config: input_size=(16,16), conv_dim=8, repeat_num=2, num_speakers=5
    input_size = (16, 16)
    params = init_discriminator_params(key, input_size=input_size, conv_dim=8,
                                       repeat_num=2, num_speakers=5)

    B = 2
    x = jax.random.normal(kx, (B, 1, input_size[0], input_size[1]), jnp.float32)

    fwd = jax.jit(discriminator_forward)
    out_src, out_cls = fwd(params, x)
    out_src = jax.block_until_ready(out_src)
    out_cls = jax.block_until_ready(out_cls)

    assert out_src.shape == (B, 1, 1, 1)
    assert out_cls.shape == (B, 5)

    ref_src, ref_cls = _ref_forward(params, x)
    assert jnp.allclose(out_src, ref_src, atol=1e-4, rtol=1e-4)
    assert jnp.allclose(out_cls, ref_cls, atol=1e-4, rtol=1e-4)

    print("KERNEL_OK")
</pallas_src>

<mosaic_0001>
module attributes {stable_mosaic.version = 11 : i64} {
  func.func @kernel(%arg0: i32, %arg1: memref<128x16xf32, #tpu.memory_space<vmem>>, %arg2: memref<16x8xf32, #tpu.memory_space<vmem>>, %arg3: memref<1x8xf32, #tpu.memory_space<vmem>>, %arg4: memref<16x32x128xf32, #tpu.memory_space<vmem>>, %arg5: memref<16x8x16xf32, #tpu.memory_space<vmem>>, %arg6: memref<1x16xf32, #tpu.memory_space<vmem>>, %arg7: memref<16x2x32xf32, #tpu.memory_space<vmem>>, %arg8: memref<16x16x6xf32, #tpu.memory_space<vmem>>, %arg9: memref<2x6xf32, #tpu.memory_space<vmem>>) attributes {dimension_semantics = [#tpu.dimension_semantics<arbitrary>], iteration_bounds = array<i64: 1>, scalar_prefetch = 0 : i64, scratch_operands = 0 : i64, tpu.core_type = #tpu.core_type<tc>, window_params = [{pipeline_mode = #tpu.pipeline_mode<synchronous>, transform_indices = @transform_0, window_bounds = array<i64: 128, 16>}, {pipeline_mode = #tpu.pipeline_mode<synchronous>, transform_indices = @transform_1, window_bounds = array<i64: 16, 8>}, {pipeline_mode = #tpu.pipeline_mode<synchronous>, transform_indices = @transform_2, window_bounds = array<i64: 1, 8>}, {pipeline_mode = #tpu.pipeline_mode<synchronous>, transform_indices = @transform_3, window_bounds = array<i64: 16, 32, 128>}, {pipeline_mode = #tpu.pipeline_mode<synchronous>, transform_indices = @transform_4, window_bounds = array<i64: 16, 8, 16>}, {pipeline_mode = #tpu.pipeline_mode<synchronous>, transform_indices = @transform_5, window_bounds = array<i64: 1, 16>}, {pipeline_mode = #tpu.pipeline_mode<synchronous>, transform_indices = @transform_6, window_bounds = array<i64: 16, 2, 32>}, {pipeline_mode = #tpu.pipeline_mode<synchronous>, transform_indices = @transform_7, window_bounds = array<i64: 16, 16, 6>}, {pipeline_mode = #tpu.pipeline_mode<synchronous>, transform_indices = @transform_8, window_bounds = array<i64: 2, 6>}]} {
    %c0 = arith.constant 0 : index
    %c0_0 = arith.constant 0 : index
    %0 = vector.load %arg1[%c0, %c0_0] : memref<128x16xf32, #tpu.memory_space<vmem>>, vector<128x16xf32>
    %c0_1 = arith.constant 0 : index
    %c0_2 = arith.constant 0 : index
    %1 = vector.load %arg2[%c0_1, %c0_2] : memref<16x8xf32, #tpu.memory_space<vmem>>, vector<16x8xf32>
    %cst = arith.constant dense<0.000000e+00> : vector<128x8xf32>
    %2 = tpu.matmul %0, %1, %cst {dimension_numbers = #tpu.dot_dimension_numbers<[1], [0], [0], [1], [0, 0, 1, 1], [], []>} : vector<128x16xf32>, vector<16x8xf32>, vector<128x8xf32> -> vector<128x8xf32>
    %c0_3 = arith.constant 0 : index
    %c0_4 = arith.constant 0 : index
    %3 = vector.load %arg3[%c0_3, %c0_4] : memref<1x8xf32, #tpu.memory_space<vmem>>, vector<1x8xf32>
    %4 = vector.broadcast %3 : vector<1x8xf32> to vector<128x8xf32>
    %5 = arith.addf %2, %4 : vector<128x8xf32>
    %cst_5 = arith.constant 0.000000e+00 : f32
    %6 = vector.broadcast %cst_5 : f32 to vector<128x8xf32>
    %7 = arith.cmpf ogt, %5, %6 : vector<128x8xf32>
    %cst_6 = arith.constant 0.00999999977 : f32
    %8 = vector.broadcast %cst_6 : f32 to vector<128x8xf32>
    %9 = arith.mulf %8, %5 : vector<128x8xf32>
    %10 = arith.select %7, %5, %9 : vector<128x8xi1>, vector<128x8xf32>
    %cst_7 = arith.constant 0.000000e+00 : f32
    %11 = vector.broadcast %cst_7 : f32 to vector<32x16xf32>
    %c0_8 = arith.constant 0 : index
    %c0_9 = arith.constant 0 : index
    %c0_10 = arith.constant 0 : index
    %12 = vector.load %arg4[%c0_8, %c0_9, %c0_10] : memref<16x32x128xf32, #tpu.memory_space<vmem>>, vector<1x32x128xf32>
    %13 = vector.shape_cast %12 : vector<1x32x128xf32> to vector<32x128xf32>
    %cst_11 = arith.constant dense<0.000000e+00> : vector<32x8xf32>
    %14 = tpu.matmul %13, %10, %cst_11 {dimension_numbers = #tpu.dot_dimension_numbers<[1], [0], [0], [1], [0, 0, 1, 1], [], []>} : vector<32x128xf32>, vector<128x8xf32>, vector<32x8xf32> -> vector<32x8xf32>
    %c0_12 = arith.constant 0 : index
    %c0_13 = arith.constant 0 : index
    %c0_14 = arith.constant 0 : index
    %15 = vector.load %arg5[%c0_12, %c0_13, %c0_14] : memref<16x8x16xf32, #tpu.memory_space<vmem>>, vector<1x8x16xf32>
    %16 = vector.shape_cast %15 : vector<1x8x16xf32> to vector<8x16xf32>
    %cst_15 = arith.constant dense<0.000000e+00> : vector<32x16xf32>
    %17 = tpu.matmul %14, %16, %cst_15 {dimension_numbers = #tpu.dot_dimension_numbers<[1], [0], [0], [1], [0, 0, 1, 1], [], []>} : vector<32x8xf32>, vector<8x16xf32>, vector<32x16xf32> -> vector<32x16xf32>
    %18 = arith.addf %11, %17 : vector<32x16xf32>
    %c1 = arith.constant 1 : index
    %c0_16 = arith.constant 0 : index
    %c0_17 = arith.constant 0 : index
    %19 = vector.load %arg4[%c1, %c0_16, %c0_17] : memref<16x32x128xf32, #tpu.memory_space<vmem>>, vector<1x32x128xf32>
    %20 = vector.shape_cast %19 : vector<1x32x128xf32> to vector<32x128xf32>
    %cst_18 = arith.constant dense<0.000000e+00> : vector<32x8xf32>
    %21 = tpu.matmul %20, %10, %cst_18 {dimension_numbers = #tpu.dot_dimension_numbers<[1], [0], [0], [1], [0, 0, 1, 1], [], []>} : vector<32x128xf32>, vector<128x8xf32>, vector<32x8xf32> -> vector<32x8xf32>
    %c1_19 = arith.constant 1 : index
    %c0_20 = arith.constant 0 : index
    %c0_21 = arith.constant 0 : index
    %22 = vector.load %arg5[%c1_19, %c0_20, %c0_21] : memref<16x8x16xf32, #tpu.memory_space<vmem>>, vector<1x8x16xf32>
    %23 = vector.shape_cast %22 : vector<1x8x16xf32> to vector<8x16xf32>
    %cst_22 = arith.constant dense<0.000000e+00> : vector<32x16xf32>
    %24 = tpu.matmul %21, %23, %cst_22 {dimension_numbers = #tpu.dot_dimension_numbers<[1], [0], [0], [1], [0, 0, 1, 1], [], []>} : vector<32x8xf32>, vector<8x16xf32>, vector<32x16xf32> -> vector<32x16xf32>
    %25 = arith.addf %18, %24 : vector<32x16xf32>
    %c2 = arith.constant 2 : index
    %c0_23 = arith.constant 0 : index
    %c0_24 = arith.constant 0 : index
    %26 = vector.load %arg4[%c2, %c0_23, %c0_24] : memref<16x32x128xf32, #tpu.memory_space<vmem>>, vector<1x32x128xf32>
    %27 = vector.shape_cast %26 : vector<1x32x128xf32> to vector<32x128xf32>
    %cst_25 = arith.constant dense<0.000000e+00> : vector<32x8xf32>
    %28 = tpu.matmul %27, %10, %cst_25 {dimension_numbers = #tpu.dot_dimension_numbers<[1], [0], [0], [1], [0, 0, 1, 1], [], []>} : vector<32x128xf32>, vector<128x8xf32>, vector<32x8xf32> -> vector<32x8xf32>
    %c2_26 = arith.constant 2 : index
    %c0_27 = arith.constant 0 : index
    %c0_28 = arith.constant 0 : index
    %29 = vector.load %arg5[%c2_26, %c0_27, %c0_28] : memref<16x8x16xf32, #tpu.memory_space<vmem>>, vector<1x8x16xf32>
    %30 = vector.shape_cast %29 : vector<1x8x16xf32> to vector<8x16xf32>
    %cst_29 = arith.constant dense<0.000000e+00> : vector<32x16xf32>
    %31 = tpu.matmul %28, %30, %cst_29 {dimension_numbers = #tpu.dot_dimension_numbers<[1], [0], [0], [1], [0, 0, 1, 1], [], []>} : vector<32x8xf32>, vector<8x16xf32>, vector<32x16xf32> -> vector<32x16xf32>
    %32 = arith.addf %25, %31 : vector<32x16xf32>
    %c3 = arith.constant 3 : index
    %c0_30 = arith.constant 0 : index
    %c0_31 = arith.constant 0 : index
    %33 = vector.load %arg4[%c3, %c0_30, %c0_31] : memref<16x32x128xf32, #tpu.memory_space<vmem>>, vector<1x32x128xf32>
    %34 = vector.shape_cast %33 : vector<1x32x128xf32> to vector<32x128xf32>
    %cst_32 = arith.constant dense<0.000000e+00> : vector<32x8xf32>
    %35 = tpu.matmul %34, %10, %cst_32 {dimension_numbers = #tpu.dot_dimension_numbers<[1], [0], [0], [1], [0, 0, 1, 1], [], []>} : vector<32x128xf32>, vector<128x8xf32>, vector<32x8xf32> -> vector<32x8xf32>
    %c3_33 = arith.constant 3 : index
    %c0_34 = arith.constant 0 : index
    %c0_35 = arith.constant 0 : index
    %36 = vector.load %arg5[%c3_33, %c0_34, %c0_35] : memref<16x8x16xf32, #tpu.memory_space<vmem>>, vector<1x8x16xf32>
    %37 = vector.shape_cast %36 : vector<1x8x16xf32> to vector<8x16xf32>
    %cst_36 = arith.constant dense<0.000000e+00> : vector<32x16xf32>
    %38 = tpu.matmul %35, %37, %cst_36 {dimension_numbers = #tpu.dot_dimension_numbers<[1], [0], [0], [1], [0, 0, 1, 1], [], []>} : vector<32x8xf32>, vector<8x16xf32>, vector<32x16xf32> -> vector<32x16xf32>
    %39 = arith.addf %32, %38 : vector<32x16xf32>
    %c4 = arith.constant 4 : index
    %c0_37 = arith.constant 0 : index
    %c0_38 = arith.constant 0 : index
    %40 = vector.load %arg4[%c4, %c0_37, %c0_38] : memref<16x32x128xf32, #tpu.memory_space<vmem>>, vector<1x32x128xf32>
    %41 = vector.shape_cast %40 : vector<1x32x128xf32> to vector<32x128xf32>
    %cst_39 = arith.constant dense<0.000000e+00> : vector<32x8xf32>
    %42 = tpu.matmul %41, %10, %cst_39 {dimension_numbers = #tpu.dot_dimension_numbers<[1], [0], [0], [1], [0, 0, 1, 1], [], []>} : vector<32x128xf32>, vector<128x8xf32>, vector<32x8xf32> -> vector<32x8xf32>
    %c4_40 = arith.constant 4 : index
    %c0_41 = arith.constant 0 : index
    %c0_42 = arith.constant 0 : index
    %43 = vector.load %arg5[%c4_40, %c0_41, %c0_42] : memref<16x8x16xf32, #tpu.memory_space<vmem>>, vector<1x8x16xf32>
    %44 = vector.shape_cast %43 : vector<1x8x16xf32> to vector<8x16xf32>
    %cst_43 = arith.constant dense<0.000000e+00> : vector<32x16xf32>
    %45 = tpu.matmul %42, %44, %cst_43 {dimension_numbers = #tpu.dot_dimension_numbers<[1], [0], [0], [1], [0, 0, 1, 1], [], []>} : vector<32x8xf32>, vector<8x16xf32>, vector<32x16xf32> -> vector<32x16xf32>
    %46 = arith.addf %39, %45 : vector<32x16xf32>
    %c5 = arith.constant 5 : index
    %c0_44 = arith.constant 0 : index
    %c0_45 = arith.constant 0 : index
    %47 = vector.load %arg4[%c5, %c0_44, %c0_45] : memref<16x32x128xf32, #tpu.memory_space<vmem>>, vector<1x32x128xf32>
    %48 = vector.shape_cast %47 : vector<1x32x128xf32> to vector<32x128xf32>
    %cst_46 = arith.constant dense<0.000000e+00> : vector<32x8xf32>
    %49 = tpu.matmul %48, %10, %cst_46 {dimension_numbers = #tpu.dot_dimension_numbers<[1], [0], [0], [1], [0, 0, 1, 1], [], []>} : vector<32x128xf32>, vector<128x8xf32>, vector<32x8xf32> -> vector<32x8xf32>
    %c5_47 = arith.constant 5 : index
    %c0_48 = arith.constant 0 : index
    %c0_49 = arith.constant 0 : index
    %50 = vector.load %arg5[%c5_47, %c0_48, %c0_49] : memref<16x8x16xf32, #tpu.memory_space<vmem>>, vector<1x8x16xf32>
    %51 = vector.shape_cast %50 : vector<1x8x16xf32> to vector<8x16xf32>
    %cst_50 = arith.constant dense<0.000000e+00> : vector<32x16xf32>
    %52 = tpu.matmul %49, %51, %cst_50 {dimension_numbers = #tpu.dot_dimension_numbers<[1], [0], [0], [1], [0, 0, 1, 1], [], []>} : vector<32x8xf32>, vector<8x16xf32>, vector<32x16xf32> -> vector<32x16xf32>
    %53 = arith.addf %46, %52 : vector<32x16xf32>
    %c6 = arith.constant 6 : index
    %c0_51 = arith.constant 0 : index
    %c0_52 = arith.constant 0 : index
    %54 = vector.load %arg4[%c6, %c0_51, %c0_52] : memref<16x32x128xf32, #tpu.memory_space<vmem>>, vector<1x32x128xf32>
    %55 = vector.shape_cast %54 : vector<1x32x128xf32> to vector<32x128xf32>
    %cst_53 = arith.constant dense<0.000000e+00> : vector<32x8xf32>
    %56 = tpu.matmul %55, %10, %cst_53 {dimension_numbers = #tpu.dot_dimension_numbers<[1], [0], [0], [1], [0, 0, 1, 1], [], []>} : vector<32x128xf32>, vector<128x8xf32>, vector<32x8xf32> -> vector<32x8xf32>
    %c6_54 = arith.constant 6 : index
    %c0_55 = arith.constant 0 : index
    %c0_56 = arith.constant 0 : index
    %57 = vector.load %arg5[%c6_54, %c0_55, %c0_56] : memref<16x8x16xf32, #tpu.memory_space<vmem>>, vector<1x8x16xf32>
    %58 = vector.shape_cast %57 : vector<1x8x16xf32> to vector<8x16xf32>
    %cst_57 = arith.constant dense<0.000000e+00> : vector<32x16xf32>
    %59 = tpu.matmul %56, %58, %cst_57 {dimension_numbers = #tpu.dot_dimension_numbers<[1], [0], [0], [1], [0, 0, 1, 1], [], []>} : vector<32x8xf32>, vector<8x16xf32>, vector<32x16xf32> -> vector<32x16xf32>
    %60 = arith.addf %53, %59 : vector<32x16xf32>
    %c7 = arith.constant 7 : index
    %c0_58 = arith.constant 0 : index
    %c0_59 = arith.constant 0 : index
    %61 = vector.load %arg4[%c7, %c0_58, %c0_59] : memref<16x32x128xf32, #tpu.memory_space<vmem>>, vector<1x32x128xf32>
    %62 = vector.shape_cast %61 : vector<1x32x128xf32> to vector<32x128xf32>
    %cst_60 = arith.constant dense<0.000000e+00> : vector<32x8xf32>
    %63 = tpu.matmul %62, %10, %cst_60 {dimension_numbers = #tpu.dot_dimension_numbers<[1], [0], [0], [1], [0, 0, 1, 1], [], []>} : vector<32x128xf32>, vector<128x8xf32>, vector<32x8xf32> -> vector<32x8xf32>
    %c7_61 = arith.constant 7 : index
    %c0_62 = arith.constant 0 : index
    %c0_63 = arith.constant 0 : index
    %64 = vector.load %arg5[%c7_61, %c0_62, %c0_63] : memref<16x8x16xf32, #tpu.memory_space<vmem>>, vector<1x8x16xf32>
    %65 = vector.shape_cast %64 : vector<1x8x16xf32> to vector<8x16xf32>
    %cst_64 = arith.constant dense<0.000000e+00> : vector<32x16xf32>
    %66 = tpu.matmul %63, %65, %cst_64 {dimension_numbers = #tpu.dot_dimension_numbers<[1], [0], [0], [1], [0, 0, 1, 1], [], []>} : vector<32x8xf32>, vector<8x16xf32>, vector<32x16xf32> -> vector<32x16xf32>
    %67 = arith.addf %60, %66 : vector<32x16xf32>
    %c8 = arith.constant 8 : index
    %c0_65 = arith.constant 0 : index
    %c0_66 = arith.constant 0 : index
    %68 = vector.load %arg4[%c8, %c0_65, %c0_66] : memref<16x32x128xf32, #tpu.memory_space<vmem>>, vector<1x32x128xf32>
    %69 = vector.shape_cast %68 : vector<1x32x128xf32> to vector<32x128xf32>
    %cst_67 = arith.constant dense<0.000000e+00> : vector<32x8xf32>
    %70 = tpu.matmul %69, %10, %cst_67 {dimension_numbers = #tpu.dot_dimension_numbers<[1], [0], [0], [1], [0, 0, 1, 1], [], []>} : vector<32x128xf32>, vector<128x8xf32>, vector<32x8xf32> -> vector<32x8xf32>
    %c8_68 = arith.constant 8 : index
    %c0_69 = arith.constant 0 : index
    %c0_70 = arith.constant 0 : index
    %71 = vector.load %arg5[%c8_68, %c0_69, %c0_70] : memref<16x8x16xf32, #tpu.memory_space<vmem>>, vector<1x8x16xf32>
    %72 = vector.shape_cast %71 : vector<1x8x16xf32> to vector<8x16xf32>
    %cst_71 = arith.constant dense<0.000000e+00> : vector<32x16xf32>
    %73 = tpu.matmul %70, %72, %cst_71 {dimension_numbers = #tpu.dot_dimension_numbers<[1], [0], [0], [1], [0, 0, 1, 1], [], []>} : vector<32x8xf32>, vector<8x16xf32>, vector<32x16xf32> -> vector<32x16xf32>
    %74 = arith.addf %67, %73 : vector<32x16xf32>
    %c9 = arith.constant 9 : index
    %c0_72 = arith.constant 0 : index
    %c0_73 = arith.constant 0 : index
    %75 = vector.load %arg4[%c9, %c0_72, %c0_73] : memref<16x32x128xf32, #tpu.memory_space<vmem>>, vector<1x32x128xf32>
    %76 = vector.shape_cast %75 : vector<1x32x128xf32> to vector<32x128xf32>
    %cst_74 = arith.constant dense<0.000000e+00> : vector<32x8xf32>
    %77 = tpu.matmul %76, %10, %cst_74 {dimension_numbers = #tpu.dot_dimension_numbers<[1], [0], [0], [1], [0, 0, 1, 1], [], []>} : vector<32x128xf32>, vector<128x8xf32>, vector<32x8xf32> -> vector<32x8xf32>
    %c9_75 = arith.constant 9 : index
    %c0_76 = arith.constant 0 : index
    %c0_77 = arith.constant 0 : index
    %78 = vector.load %arg5[%c9_75, %c0_76, %c0_77] : memref<16x8x16xf32, #tpu.memory_space<vmem>>, vector<1x8x16xf32>
    %79 = vector.shape_cast %78 : vector<1x8x16xf32> to vector<8x16xf32>
    %cst_78 = arith.constant dense<0.000000e+00> : vector<32x16xf32>
    %80 = tpu.matmul %77, %79, %cst_78 {dimension_numbers = #tpu.dot_dimension_numbers<[1], [0], [0], [1], [0, 0, 1, 1], [], []>} : vector<32x8xf32>, vector<8x16xf32>, vector<32x16xf32> -> vector<32x16xf32>
    %81 = arith.addf %74, %80 : vector<32x16xf32>
    %c10 = arith.constant 10 : index
    %c0_79 = arith.constant 0 : index
    %c0_80 = arith.constant 0 : index
    %82 = vector.load %arg4[%c10, %c0_79, %c0_80] : memref<16x32x128xf32, #tpu.memory_space<vmem>>, vector<1x32x128xf32>
    %83 = vector.shape_cast %82 : vector<1x32x128xf32> to vector<32x128xf32>
    %cst_81 = arith.constant dense<0.000000e+00> : vector<32x8xf32>
    %84 = tpu.matmul %83, %10, %cst_81 {dimension_numbers = #tpu.dot_dimension_numbers<[1], [0], [0], [1], [0, 0, 1, 1], [], []>} : vector<32x128xf32>, vector<128x8xf32>, vector<32x8xf32> -> vector<32x8xf32>
    %c10_82 = arith.constant 10 : index
    %c0_83 = arith.constant 0 : index
    %c0_84 = arith.constant 0 : index
    %85 = vector.load %arg5[%c10_82, %c0_83, %c0_84] : memref<16x8x16xf32, #tpu.memory_space<vmem>>, vector<1x8x16xf32>
    %86 = vector.shape_cast %85 : vector<1x8x16xf32> to vector<8x16xf32>
    %cst_85 = arith.constant dense<0.000000e+00> : vector<32x16xf32>
    %87 = tpu.matmul %84, %86, %cst_85 {dimension_numbers = #tpu.dot_dimension_numbers<[1], [0], [0], [1], [0, 0, 1, 1], [], []>} : vector<32x8xf32>, vector<8x16xf32>, vector<32x16xf32> -> vector<32x16xf32>
    %88 = arith.addf %81, %87 : vector<32x16xf32>
    %c11 = arith.constant 11 : index
    %c0_86 = arith.constant 0 : index
    %c0_87 = arith.constant 0 : index
    %89 = vector.load %arg4[%c11, %c0_86, %c0_87] : memref<16x32x128xf32, #tpu.memory_space<vmem>>, vector<1x32x128xf32>
    %90 = vector.shape_cast %89 : vector<1x32x128xf32> to vector<32x128xf32>
    %cst_88 = arith.constant dense<0.000000e+00> : vector<32x8xf32>
    %91 = tpu.matmul %90, %10, %cst_88 {dimension_numbers = #tpu.dot_dimension_numbers<[1], [0], [0], [1], [0, 0, 1, 1], [], []>} : vector<32x128xf32>, vector<128x8xf32>, vector<32x8xf32> -> vector<32x8xf32>
    %c11_89 = arith.constant 11 : index
    %c0_90 = arith.constant 0 : index
    %c0_91 = arith.constant 0 : index
    %92 = vector.load %arg5[%c11_89, %c0_90, %c0_91] : memref<16x8x16xf32, #tpu.memory_space<vmem>>, vector<1x8x16xf32>
    %93 = vector.shape_cast %92 : vector<1x8x16xf32> to vector<8x16xf32>
    %cst_92 = arith.constant dense<0.000000e+00> : vector<32x16xf32>
    %94 = tpu.matmul %91, %93, %cst_92 {dimension_numbers = #tpu.dot_dimension_numbers<[1], [0], [0], [1], [0, 0, 1, 1], [], []>} : vector<32x8xf32>, vector<8x16xf32>, vector<32x16xf32> -> vector<32x16xf32>
    %95 = arith.addf %88, %94 : vector<32x16xf32>
    %c12 = arith.constant 12 : index
    %c0_93 = arith.constant 0 : index
    %c0_94 = arith.constant 0 : index
    %96 = vector.load %arg4[%c12, %c0_93, %c0_94] : memref<16x32x128xf32, #tpu.memory_space<vmem>>, vector<1x32x128xf32>
    %97 = vector.shape_cast %96 : vector<1x32x128xf32> to vector<32x128xf32>
    %cst_95 = arith.constant dense<0.000000e+00> : vector<32x8xf32>
    %98 = tpu.matmul %97, %10, %cst_95 {dimension_numbers = #tpu.dot_dimension_numbers<[1], [0], [0], [1], [0, 0, 1, 1], [], []>} : vector<32x128xf32>, vector<128x8xf32>, vector<32x8xf32> -> vector<32x8xf32>
    %c12_96 = arith.constant 12 : index
    %c0_97 = arith.constant 0 : index
    %c0_98 = arith.constant 0 : index
    %99 = vector.load %arg5[%c12_96, %c0_97, %c0_98] : memref<16x8x16xf32, #tpu.memory_space<vmem>>, vector<1x8x16xf32>
    %100 = vector.shape_cast %99 : vector<1x8x16xf32> to vector<8x16xf32>
    %cst_99 = arith.constant dense<0.000000e+00> : vector<32x16xf32>
    %101 = tpu.matmul %98, %100, %cst_99 {dimension_numbers = #tpu.dot_dimension_numbers<[1], [0], [0], [1], [0, 0, 1, 1], [], []>} : vector<32x8xf32>, vector<8x16xf32>, vector<32x16xf32> -> vector<32x16xf32>
    %102 = arith.addf %95, %101 : vector<32x16xf32>
    %c13 = arith.constant 13 : index
    %c0_100 = arith.constant 0 : index
    %c0_101 = arith.constant 0 : index
    %103 = vector.load %arg4[%c13, %c0_100, %c0_101] : memref<16x32x128xf32, #tpu.memory_space<vmem>>, vector<1x32x128xf32>
    %104 = vector.shape_cast %103 : vector<1x32x128xf32> to vector<32x128xf32>
    %cst_102 = arith.constant dense<0.000000e+00> : vector<32x8xf32>
    %105 = tpu.matmul %104, %10, %cst_102 {dimension_numbers = #tpu.dot_dimension_numbers<[1], [0], [0], [1], [0, 0, 1, 1], [], []>} : vector<32x128xf32>, vector<128x8xf32>, vector<32x8xf32> -> vector<32x8xf32>
    %c13_103 = arith.constant 13 : index
    %c0_104 = arith.constant 0 : index
    %c0_105 = arith.constant 0 : index
    %106 = vector.load %arg5[%c13_103, %c0_104, %c0_105] : memref<16x8x16xf32, #tpu.memory_space<vmem>>, vector<1x8x16xf32>
    %107 = vector.shape_cast %106 : vector<1x8x16xf32> to vector<8x16xf32>
    %cst_106 = arith.constant dense<0.000000e+00> : vector<32x16xf32>
    %108 = tpu.matmul %105, %107, %cst_106 {dimension_numbers = #tpu.dot_dimension_numbers<[1], [0], [0], [1], [0, 0, 1, 1], [], []>} : vector<32x8xf32>, vector<8x16xf32>, vector<32x16xf32> -> vector<32x16xf32>
    %109 = arith.addf %102, %108 : vector<32x16xf32>
    %c14 = arith.constant 14 : index
    %c0_107 = arith.constant 0 : index
    %c0_108 = arith.constant 0 : index
    %110 = vector.load %arg4[%c14, %c0_107, %c0_108] : memref<16x32x128xf32, #tpu.memory_space<vmem>>, vector<1x32x128xf32>
    %111 = vector.shape_cast %110 : vector<1x32x128xf32> to vector<32x128xf32>
    %cst_109 = arith.constant dense<0.000000e+00> : vector<32x8xf32>
    %112 = tpu.matmul %111, %10, %cst_109 {dimension_numbers = #tpu.dot_dimension_numbers<[1], [0], [0], [1], [0, 0, 1, 1], [], []>} : vector<32x128xf32>, vector<128x8xf32>, vector<32x8xf32> -> vector<32x8xf32>
    %c14_110 = arith.constant 14 : index
    %c0_111 = arith.constant 0 : index
    %c0_112 = arith.constant 0 : index
    %113 = vector.load %arg5[%c14_110, %c0_111, %c0_112] : memref<16x8x16xf32, #tpu.memory_space<vmem>>, vector<1x8x16xf32>
    %114 = vector.shape_cast %113 : vector<1x8x16xf32> to vector<8x16xf32>
    %cst_113 = arith.constant dense<0.000000e+00> : vector<32x16xf32>
    %115 = tpu.matmul %112, %114, %cst_113 {dimension_numbers = #tpu.dot_dimension_numbers<[1], [0], [0], [1], [0, 0, 1, 1], [], []>} : vector<32x8xf32>, vector<8x16xf32>, vector<32x16xf32> -> vector<32x16xf32>
    %116 = arith.addf %109, %115 : vector<32x16xf32>
    %c15 = arith.constant 15 : index
    %c0_114 = arith.constant 0 : index
    %c0_115 = arith.constant 0 : index
    %117 = vector.load %arg4[%c15, %c0_114, %c0_115] : memref<16x32x128xf32, #tpu.memory_space<vmem>>, vector<1x32x128xf32>
    %118 = vector.shape_cast %117 : vector<1x32x128xf32> to vector<32x128xf32>
    %cst_116 = arith.constant dense<0.000000e+00> : vector<32x8xf32>
    %119 = tpu.matmul %118, %10, %cst_116 {dimension_numbers = #tpu.dot_dimension_numbers<[1], [0], [0], [1], [0, 0, 1, 1], [], []>} : vector<32x128xf32>, vector<128x8xf32>, vector<32x8xf32> -> vector<32x8xf32>
    %c15_117 = arith.constant 15 : index
    %c0_118 = arith.constant 0 : index
    %c0_119 = arith.constant 0 : index
    %120 = vector.load %arg5[%c15_117, %c0_118, %c0_119] : memref<16x8x16xf32, #tpu.memory_space<vmem>>, vector<1x8x16xf32>
    %121 = vector.shape_cast %120 : vector<1x8x16xf32> to vector<8x16xf32>
    %cst_120 = arith.constant dense<0.000000e+00> : vector<32x16xf32>
    %122 = tpu.matmul %119, %121, %cst_120 {dimension_numbers = #tpu.dot_dimension_numbers<[1], [0], [0], [1], [0, 0, 1, 1], [], []>} : vector<32x8xf32>, vector<8x16xf32>, vector<32x16xf32> -> vector<32x16xf32>
    %123 = arith.addf %116, %122 : vector<32x16xf32>
    %c0_121 = arith.constant 0 : index
    %c0_122 = arith.constant 0 : index
    %124 = vector.load %arg6[%c0_121, %c0_122] : memref<1x16xf32, #tpu.memory_space<vmem>>, vector<1x16xf32>
    %125 = vector.broadcast %124 : vector<1x16xf32> to vector<32x16xf32>
    %126 = arith.addf %123, %125 : vector<32x16xf32>
    %cst_123 = arith.constant 0.000000e+00 : f32
    %127 = vector.broadcast %cst_123 : f32 to vector<32x16xf32>
    %128 = arith.cmpf ogt, %126, %127 : vector<32x16xf32>
    %cst_124 = arith.constant 0.00999999977 : f32
    %129 = vector.broadcast %cst_124 : f32 to vector<32x16xf32>
    %130 = arith.mulf %129, %126 : vector<32x16xf32>
    %131 = arith.select %128, %126, %130 : vector<32x16xi1>, vector<32x16xf32>
    %cst_125 = arith.constant 0.000000e+00 : f32
    %132 = vector.broadcast %cst_125 : f32 to vector<2x6xf32>
    %c0_126 = arith.constant 0 : index
    %c0_127 = arith.constant 0 : index
    %c0_128 = arith.constant 0 : index
    %133 = vector.load %arg7[%c0_126, %c0_127, %c0_128] : memref<16x2x32xf32, #tpu.memory_space<vmem>>, vector<1x2x32xf32>
    %134 = vector.shape_cast %133 : vector<1x2x32xf32> to vector<2x32xf32>
    %cst_129 = arith.constant dense<0.000000e+00> : vector<2x16xf32>
    %135 = tpu.matmul %134, %131, %cst_129 {dimension_numbers = #tpu.dot_dimension_numbers<[1], [0], [0], [1], [0, 0, 1, 1], [], []>} : vector<2x32xf32>, vector<32x16xf32>, vector<2x16xf32> -> vector<2x16xf32>
    %c0_130 = arith.constant 0 : index
    %c0_131 = arith.constant 0 : index
    %c0_132 = arith.constant 0 : index
    %136 = vector.load %arg8[%c0_130, %c0_131, %c0_132] : memref<16x16x6xf32, #tpu.memory_space<vmem>>, vector<1x16x6xf32>
    %137 = vector.shape_cast %136 : vector<1x16x6xf32> to vector<16x6xf32>
    %cst_133 = arith.constant dense<0.000000e+00> : vector<2x6xf32>
    %138 = tpu.matmul %135, %137, %cst_133 {dimension_numbers = #tpu.dot_dimension_numbers<[1], [0], [0], [1], [0, 0, 1, 1], [], []>} : vector<2x16xf32>, vector<16x6xf32>, vector<2x6xf32> -> vector<2x6xf32>
    %139 = arith.addf %132, %138 : vector<2x6xf32>
    %c1_134 = arith.constant 1 : index
    %c0_135 = arith.constant 0 : index
    %c0_136 = arith.constant 0 : index
    %140 = vector.load %arg7[%c1_134, %c0_135, %c0_136] : memref<16x2x32xf32, #tpu.memory_space<vmem>>, vector<1x2x32xf32>
    %141 = vector.shape_cast %140 : vector<1x2x32xf32> to vector<2x32xf32>
    %cst_137 = arith.constant dense<0.000000e+00> : vector<2x16xf32>
    %142 = tpu.matmul %141, %131, %cst_137 {dimension_numbers = #tpu.dot_dimension_numbers<[1], [0], [0], [1], [0, 0, 1, 1], [], []>} : vector<2x32xf32>, vector<32x16xf32>, vector<2x16xf32> -> vector<2x16xf32>
    %c1_138 = arith.constant 1 : index
    %c0_139 = arith.constant 0 : index
    %c0_140 = arith.constant 0 : index
    %143 = vector.load %arg8[%c1_138, %c0_139, %c0_140] : memref<16x16x6xf32, #tpu.memory_space<vmem>>, vector<1x16x6xf32>
    %144 = vector.shape_cast %143 : vector<1x16x6xf32> to vector<16x6xf32>
    %cst_141 = arith.constant dense<0.000000e+00> : vector<2x6xf32>
    %145 = tpu.matmul %142, %144, %cst_141 {dimension_numbers = #tpu.dot_dimension_numbers<[1], [0], [0], [1], [0, 0, 1, 1], [], []>} : vector<2x16xf32>, vector<16x6xf32>, vector<2x6xf32> -> vector<2x6xf32>
    %146 = arith.addf %139, %145 : vector<2x6xf32>
    %c2_142 = arith.constant 2 : index
    %c0_143 = arith.constant 0 : index
    %c0_144 = arith.constant 0 : index
    %147 = vector.load %arg7[%c2_142, %c0_143, %c0_144] : memref<16x2x32xf32, #tpu.memory_space<vmem>>, vector<1x2x32xf32>
    %148 = vector.shape_cast %147 : vector<1x2x32xf32> to vector<2x32xf32>
    %cst_145 = arith.constant dense<0.000000e+00> : vector<2x16xf32>
    %149 = tpu.matmul %148, %131, %cst_145 {dimension_numbers = #tpu.dot_dimension_numbers<[1], [0], [0], [1], [0, 0, 1, 1], [], []>} : vector<2x32xf32>, vector<32x16xf32>, vector<2x16xf32> -> vector<2x16xf32>
    %c2_146 = arith.constant 2 : index
    %c0_147 = arith.constant 0 : index
    %c0_148 = arith.constant 0 : index
    %150 = vector.load %arg8[%c2_146, %c0_147, %c0_148] : memref<16x16x6xf32, #tpu.memory_space<vmem>>, vector<1x16x6xf32>
    %151 = vector.shape_cast %150 : vector<1x16x6xf32> to vector<16x6xf32>
    %cst_149 = arith.constant dense<0.000000e+00> : vector<2x6xf32>
    %152 = tpu.matmul %149, %151, %cst_149 {dimension_numbers = #tpu.dot_dimension_numbers<[1], [0], [0], [1], [0, 0, 1, 1], [], []>} : vector<2x16xf32>, vector<16x6xf32>, vector<2x6xf32> -> vector<2x6xf32>
    %153 = arith.addf %146, %152 : vector<2x6xf32>
    %c3_150 = arith.constant 3 : index
    %c0_151 = arith.constant 0 : index
    %c0_152 = arith.constant 0 : index
    %154 = vector.load %arg7[%c3_150, %c0_151, %c0_152] : memref<16x2x32xf32, #tpu.memory_space<vmem>>, vector<1x2x32xf32>
    %155 = vector.shape_cast %154 : vector<1x2x32xf32> to vector<2x32xf32>
    %cst_153 = arith.constant dense<0.000000e+00> : vector<2x16xf32>
    %156 = tpu.matmul %155, %131, %cst_153 {dimension_numbers = #tpu.dot_dimension_numbers<[1], [0], [0], [1], [0, 0, 1, 1], [], []>} : vector<2x32xf32>, vector<32x16xf32>, vector<2x16xf32> -> vector<2x16xf32>
    %c3_154 = arith.constant 3 : index
    %c0_155 = arith.constant 0 : index
    %c0_156 = arith.constant 0 : index
    %157 = vector.load %arg8[%c3_154, %c0_155, %c0_156] : memref<16x16x6xf32, #tpu.memory_space<vmem>>, vector<1x16x6xf32>
    %158 = vector.shape_cast %157 : vector<1x16x6xf32> to vector<16x6xf32>
    %cst_157 = arith.constant dense<0.000000e+00> : vector<2x6xf32>
    %159 = tpu.matmul %156, %158, %cst_157 {dimension_numbers = #tpu.dot_dimension_numbers<[1], [0], [0], [1], [0, 0, 1, 1], [], []>} : vector<2x16xf32>, vector<16x6xf32>, vector<2x6xf32> -> vector<2x6xf32>
    %160 = arith.addf %153, %159 : vector<2x6xf32>
    %c4_158 = arith.constant 4 : index
    %c0_159 = arith.constant 0 : index
    %c0_160 = arith.constant 0 : index
    %161 = vector.load %arg7[%c4_158, %c0_159, %c0_160] : memref<16x2x32xf32, #tpu.memory_space<vmem>>, vector<1x2x32xf32>
    %162 = vector.shape_cast %161 : vector<1x2x32xf32> to vector<2x32xf32>
    %cst_161 = arith.constant dense<0.000000e+00> : vector<2x16xf32>
    %163 = tpu.matmul %162, %131, %cst_161 {dimension_numbers = #tpu.dot_dimension_numbers<[1], [0], [0], [1], [0, 0, 1, 1], [], []>} : vector<2x32xf32>, vector<32x16xf32>, vector<2x16xf32> -> vector<2x16xf32>
    %c4_162 = arith.constant 4 : index
    %c0_163 = arith.constant 0 : index
    %c0_164 = arith.constant 0 : index
    %164 = vector.load %arg8[%c4_162, %c0_163, %c0_164] : memref<16x16x6xf32, #tpu.memory_space<vmem>>, vector<1x16x6xf32>
    %165 = vector.shape_cast %164 : vector<1x16x6xf32> to vector<16x6xf32>
    %cst_165 = arith.constant dense<0.000000e+00> : vector<2x6xf32>
    %166 = tpu.matmul %163, %165, %cst_165 {dimension_numbers = #tpu.dot_dimension_numbers<[1], [0], [0], [1], [0, 0, 1, 1], [], []>} : vector<2x16xf32>, vector<16x6xf32>, vector<2x6xf32> -> vector<2x6xf32>
    %167 = arith.addf %160, %166 : vector<2x6xf32>
    %c5_166 = arith.constant 5 : index
    %c0_167 = arith.constant 0 : index
    %c0_168 = arith.constant 0 : index
    %168 = vector.load %arg7[%c5_166, %c0_167, %c0_168] : memref<16x2x32xf32, #tpu.memory_space<vmem>>, vector<1x2x32xf32>
    %169 = vector.shape_cast %168 : vector<1x2x32xf32> to vector<2x32xf32>
    %cst_169 = arith.constant dense<0.000000e+00> : vector<2x16xf32>
    %170 = tpu.matmul %169, %131, %cst_169 {dimension_numbers = #tpu.dot_dimension_numbers<[1], [0], [0], [1], [0, 0, 1, 1], [], []>} : vector<2x32xf32>, vector<32x16xf32>, vector<2x16xf32> -> vector<2x16xf32>
    %c5_170 = arith.constant 5 : index
    %c0_171 = arith.constant 0 : index
    %c0_172 = arith.constant 0 : index
    %171 = vector.load %arg8[%c5_170, %c0_171, %c0_172] : memref<16x16x6xf32, #tpu.memory_space<vmem>>, vector<1x16x6xf32>
    %172 = vector.shape_cast %171 : vector<1x16x6xf32> to vector<16x6xf32>
    %cst_173 = arith.constant dense<0.000000e+00> : vector<2x6xf32>
    %173 = tpu.matmul %170, %172, %cst_173 {dimension_numbers = #tpu.dot_dimension_numbers<[1], [0], [0], [1], [0, 0, 1, 1], [], []>} : vector<2x16xf32>, vector<16x6xf32>, vector<2x6xf32> -> vector<2x6xf32>
    %174 = arith.addf %167, %173 : vector<2x6xf32>
    %c6_174 = arith.constant 6 : index
    %c0_175 = arith.constant 0 : index
    %c0_176 = arith.constant 0 : index
    %175 = vector.load %arg7[%c6_174, %c0_175, %c0_176] : memref<16x2x32xf32, #tpu.memory_space<vmem>>, vector<1x2x32xf32>
    %176 = vector.shape_cast %175 : vector<1x2x32xf32> to vector<2x32xf32>
    %cst_177 = arith.constant dense<0.000000e+00> : vector<2x16xf32>
    %177 = tpu.matmul %176, %131, %cst_177 {dimension_numbers = #tpu.dot_dimension_numbers<[1], [0], [0], [1], [0, 0, 1, 1], [], []>} : vector<2x32xf32>, vector<32x16xf32>, vector<2x16xf32> -> vector<2x16xf32>
    %c6_178 = arith.constant 6 : index
    %c0_179 = arith.constant 0 : index
    %c0_180 = arith.constant 0 : index
    %178 = vector.load %arg8[%c6_178, %c0_179, %c0_180] : memref<16x16x6xf32, #tpu.memory_space<vmem>>, vector<1x16x6xf32>
    %179 = vector.shape_cast %178 : vector<1x16x6xf32> to vector<16x6xf32>
    %cst_181 = arith.constant dense<0.000000e+00> : vector<2x6xf32>
    %180 = tpu.matmul %177, %179, %cst_181 {dimension_numbers = #tpu.dot_dimension_numbers<[1], [0], [0], [1], [0, 0, 1, 1], [], []>} : vector<2x16xf32>, vector<16x6xf32>, vector<2x6xf32> -> vector<2x6xf32>
    %181 = arith.addf %174, %180 : vector<2x6xf32>
    %c7_182 = arith.constant 7 : index
    %c0_183 = arith.constant 0 : index
    %c0_184 = arith.constant 0 : index
    %182 = vector.load %arg7[%c7_182, %c0_183, %c0_184] : memref<16x2x32xf32, #tpu.memory_space<vmem>>, vector<1x2x32xf32>
    %183 = vector.shape_cast %182 : vector<1x2x32xf32> to vector<2x32xf32>
    %cst_185 = arith.constant dense<0.000000e+00> : vector<2x16xf32>
    %184 = tpu.matmul %183, %131, %cst_185 {dimension_numbers = #tpu.dot_dimension_numbers<[1], [0], [0], [1], [0, 0, 1, 1], [], []>} : vector<2x32xf32>, vector<32x16xf32>, vector<2x16xf32> -> vector<2x16xf32>
    %c7_186 = arith.constant 7 : index
    %c0_187 = arith.constant 0 : index
    %c0_188 = arith.constant 0 : index
    %185 = vector.load %arg8[%c7_186, %c0_187, %c0_188] : memref<16x16x6xf32, #tpu.memory_space<vmem>>, vector<1x16x6xf32>
    %186 = vector.shape_cast %185 : vector<1x16x6xf32> to vector<16x6xf32>
    %cst_189 = arith.constant dense<0.000000e+00> : vector<2x6xf32>
    %187 = tpu.matmul %184, %186, %cst_189 {dimension_numbers = #tpu.dot_dimension_numbers<[1], [0], [0], [1], [0, 0, 1, 1], [], []>} : vector<2x16xf32>, vector<16x6xf32>, vector<2x6xf32> -> vector<2x6xf32>
    %188 = arith.addf %181, %187 : vector<2x6xf32>
    %c8_190 = arith.constant 8 : index
    %c0_191 = arith.constant 0 : index
    %c0_192 = arith.constant 0 : index
    %189 = vector.load %arg7[%c8_190, %c0_191, %c0_192] : memref<16x2x32xf32, #tpu.memory_space<vmem>>, vector<1x2x32xf32>
    %190 = vector.shape_cast %189 : vector<1x2x32xf32> to vector<2x32xf32>
    %cst_193 = arith.constant dense<0.000000e+00> : vector<2x16xf32>
    %191 = tpu.matmul %190, %131, %cst_193 {dimension_numbers = #tpu.dot_dimension_numbers<[1], [0], [0], [1], [0, 0, 1, 1], [], []>} : vector<2x32xf32>, vector<32x16xf32>, vector<2x16xf32> -> vector<2x16xf32>
    %c8_194 = arith.constant 8 : index
    %c0_195 = arith.constant 0 : index
    %c0_196 = arith.constant 0 : index
    %192 = vector.load %arg8[%c8_194, %c0_195, %c0_196] : memref<16x16x6xf32, #tpu.memory_space<vmem>>, vector<1x16x6xf32>
    %193 = vector.shape_cast %192 : vector<1x16x6xf32> to vector<16x6xf32>
    %cst_197 = arith.constant dense<0.000000e+00> : vector<2x6xf32>
    %194 = tpu.matmul %191, %193, %cst_197 {dimension_numbers = #tpu.dot_dimension_numbers<[1], [0], [0], [1], [0, 0, 1, 1], [], []>} : vector<2x16xf32>, vector<16x6xf32>, vector<2x6xf32> -> vector<2x6xf32>
    %195 = arith.addf %188, %194 : vector<2x6xf32>
    %c9_198 = arith.constant 9 : index
    %c0_199 = arith.constant 0 : index
    %c0_200 = arith.constant 0 : index
    %196 = vector.load %arg7[%c9_198, %c0_199, %c0_200] : memref<16x2x32xf32, #tpu.memory_space<vmem>>, vector<1x2x32xf32>
    %197 = vector.shape_cast %196 : vector<1x2x32xf32> to vector<2x32xf32>
    %cst_201 = arith.constant dense<0.000000e+00> : vector<2x16xf32>
    %198 = tpu.matmul %197, %131, %cst_201 {dimension_numbers = #tpu.dot_dimension_numbers<[1], [0], [0], [1], [0, 0, 1, 1], [], []>} : vector<2x32xf32>, vector<32x16xf32>, vector<2x16xf32> -> vector<2x16xf32>
    %c9_202 = arith.constant 9 : index
    %c0_203 = arith.constant 0 : index
    %c0_204 = arith.constant 0 : index
    %199 = vector.load %arg8[%c9_202, %c0_203, %c0_204] : memref<16x16x6xf32, #tpu.memory_space<vmem>>, vector<1x16x6xf32>
    %200 = vector.shape_cast %199 : vector<1x16x6xf32> to vector<16x6xf32>
    %cst_205 = arith.constant dense<0.000000e+00> : vector<2x6xf32>
    %201 = tpu.matmul %198, %200, %cst_205 {dimension_numbers = #tpu.dot_dimension_numbers<[1], [0], [0], [1], [0, 0, 1, 1], [], []>} : vector<2x16xf32>, vector<16x6xf32>, vector<2x6xf32> -> vector<2x6xf32>
    %202 = arith.addf %195, %201 : vector<2x6xf32>
    %c10_206 = arith.constant 10 : index
    %c0_207 = arith.constant 0 : index
    %c0_208 = arith.constant 0 : index
    %203 = vector.load %arg7[%c10_206, %c0_207, %c0_208] : memref<16x2x32xf32, #tpu.memory_space<vmem>>, vector<1x2x32xf32>
    %204 = vector.shape_cast %203 : vector<1x2x32xf32> to vector<2x32xf32>
    %cst_209 = arith.constant dense<0.000000e+00> : vector<2x16xf32>
    %205 = tpu.matmul %204, %131, %cst_209 {dimension_numbers = #tpu.dot_dimension_numbers<[1], [0], [0], [1], [0, 0, 1, 1], [], []>} : vector<2x32xf32>, vector<32x16xf32>, vector<2x16xf32> -> vector<2x16xf32>
    %c10_210 = arith.constant 10 : index
    %c0_211 = arith.constant 0 : index
    %c0_212 = arith.constant 0 : index
    %206 = vector.load %arg8[%c10_210, %c0_211, %c0_212] : memref<16x16x6xf32, #tpu.memory_space<vmem>>, vector<1x16x6xf32>
    %207 = vector.shape_cast %206 : vector<1x16x6xf32> to vector<16x6xf32>
    %cst_213 = arith.constant dense<0.000000e+00> : vector<2x6xf32>
    %208 = tpu.matmul %205, %207, %cst_213 {dimension_numbers = #tpu.dot_dimension_numbers<[1], [0], [0], [1], [0, 0, 1, 1], [], []>} : vector<2x16xf32>, vector<16x6xf32>, vector<2x6xf32> -> vector<2x6xf32>
    %209 = arith.addf %202, %208 : vector<2x6xf32>
    %c11_214 = arith.constant 11 : index
    %c0_215 = arith.constant 0 : index
    %c0_216 = arith.constant 0 : index
    %210 = vector.load %arg7[%c11_214, %c0_215, %c0_216] : memref<16x2x32xf32, #tpu.memory_space<vmem>>, vector<1x2x32xf32>
    %211 = vector.shape_cast %210 : vector<1x2x32xf32> to vector<2x32xf32>
    %cst_217 = arith.constant dense<0.000000e+00> : vector<2x16xf32>
    %212 = tpu.matmul %211, %131, %cst_217 {dimension_numbers = #tpu.dot_dimension_numbers<[1], [0], [0], [1], [0, 0, 1, 1], [], []>} : vector<2x32xf32>, vector<32x16xf32>, vector<2x16xf32> -> vector<2x16xf32>
    %c11_218 = arith.constant 11 : index
    %c0_219 = arith.constant 0 : index
    %c0_220 = arith.constant 0 : index
    %213 = vector.load %arg8[%c11_218, %c0_219, %c0_220] : memref<16x16x6xf32, #tpu.memory_space<vmem>>, vector<1x16x6xf32>
    %214 = vector.shape_cast %213 : vector<1x16x6xf32> to vector<16x6xf32>
    %cst_221 = arith.constant dense<0.000000e+00> : vector<2x6xf32>
    %215 = tpu.matmul %212, %214, %cst_221 {dimension_numbers = #tpu.dot_dimension_numbers<[1], [0], [0], [1], [0, 0, 1, 1], [], []>} : vector<2x16xf32>, vector<16x6xf32>, vector<2x6xf32> -> vector<2x6xf32>
    %216 = arith.addf %209, %215 : vector<2x6xf32>
    %c12_222 = arith.constant 12 : index
    %c0_223 = arith.constant 0 : index
    %c0_224 = arith.constant 0 : index
    %217 = vector.load %arg7[%c12_222, %c0_223, %c0_224] : memref<16x2x32xf32, #tpu.memory_space<vmem>>, vector<1x2x32xf32>
    %218 = vector.shape_cast %217 : vector<1x2x32xf32> to vector<2x32xf32>
    %cst_225 = arith.constant dense<0.000000e+00> : vector<2x16xf32>
    %219 = tpu.matmul %218, %131, %cst_225 {dimension_numbers = #tpu.dot_dimension_numbers<[1], [0], [0], [1], [0, 0, 1, 1], [], []>} : vector<2x32xf32>, vector<32x16xf32>, vector<2x16xf32> -> vector<2x16xf32>
    %c12_226 = arith.constant 12 : index
    %c0_227 = arith.constant 0 : index
    %c0_228 = arith.constant 0 : index
    %220 = vector.load %arg8[%c12_226, %c0_227, %c0_228] : memref<16x16x6xf32, #tpu.memory_space<vmem>>, vector<1x16x6xf32>
    %221 = vector.shape_cast %220 : vector<1x16x6xf32> to vector<16x6xf32>
    %cst_229 = arith.constant dense<0.000000e+00> : vector<2x6xf32>
    %222 = tpu.matmul %219, %221, %cst_229 {dimension_numbers = #tpu.dot_dimension_numbers<[1], [0], [0], [1], [0, 0, 1, 1], [], []>} : vector<2x16xf32>, vector<16x6xf32>, vector<2x6xf32> -> vector<2x6xf32>
    %223 = arith.addf %216, %222 : vector<2x6xf32>
    %c13_230 = arith.constant 13 : index
    %c0_231 = arith.constant 0 : index
    %c0_232 = arith.constant 0 : index
    %224 = vector.load %arg7[%c13_230, %c0_231, %c0_232] : memref<16x2x32xf32, #tpu.memory_space<vmem>>, vector<1x2x32xf32>
    %225 = vector.shape_cast %224 : vector<1x2x32xf32> to vector<2x32xf32>
    %cst_233 = arith.constant dense<0.000000e+00> : vector<2x16xf32>
    %226 = tpu.matmul %225, %131, %cst_233 {dimension_numbers = #tpu.dot_dimension_numbers<[1], [0], [0], [1], [0, 0, 1, 1], [], []>} : vector<2x32xf32>, vector<32x16xf32>, vector<2x16xf32> -> vector<2x16xf32>
    %c13_234 = arith.constant 13 : index
    %c0_235 = arith.constant 0 : index
    %c0_236 = arith.constant 0 : index
    %227 = vector.load %arg8[%c13_234, %c0_235, %c0_236] : memref<16x16x6xf32, #tpu.memory_space<vmem>>, vector<1x16x6xf32>
    %228 = vector.shape_cast %227 : vector<1x16x6xf32> to vector<16x6xf32>
    %cst_237 = arith.constant dense<0.000000e+00> : vector<2x6xf32>
    %229 = tpu.matmul %226, %228, %cst_237 {dimension_numbers = #tpu.dot_dimension_numbers<[1], [0], [0], [1], [0, 0, 1, 1], [], []>} : vector<2x16xf32>, vector<16x6xf32>, vector<2x6xf32> -> vector<2x6xf32>
    %230 = arith.addf %223, %229 : vector<2x6xf32>
    %c14_238 = arith.constant 14 : index
    %c0_239 = arith.constant 0 : index
    %c0_240 = arith.constant 0 : index
    %231 = vector.load %arg7[%c14_238, %c0_239, %c0_240] : memref<16x2x32xf32, #tpu.memory_space<vmem>>, vector<1x2x32xf32>
    %232 = vector.shape_cast %231 : vector<1x2x32xf32> to vector<2x32xf32>
    %cst_241 = arith.constant dense<0.000000e+00> : vector<2x16xf32>
    %233 = tpu.matmul %232, %131, %cst_241 {dimension_numbers = #tpu.dot_dimension_numbers<[1], [0], [0], [1], [0, 0, 1, 1], [], []>} : vector<2x32xf32>, vector<32x16xf32>, vector<2x16xf32> -> vector<2x16xf32>
    %c14_242 = arith.constant 14 : index
    %c0_243 = arith.constant 0 : index
    %c0_244 = arith.constant 0 : index
    %234 = vector.load %arg8[%c14_242, %c0_243, %c0_244] : memref<16x16x6xf32, #tpu.memory_space<vmem>>, vector<1x16x6xf32>
    %235 = vector.shape_cast %234 : vector<1x16x6xf32> to vector<16x6xf32>
    %cst_245 = arith.constant dense<0.000000e+00> : vector<2x6xf32>
    %236 = tpu.matmul %233, %235, %cst_245 {dimension_numbers = #tpu.dot_dimension_numbers<[1], [0], [0], [1], [0, 0, 1, 1], [], []>} : vector<2x16xf32>, vector<16x6xf32>, vector<2x6xf32> -> vector<2x6xf32>
    %237 = arith.addf %230, %236 : vector<2x6xf32>
    %c15_246 = arith.constant 15 : index
    %c0_247 = arith.constant 0 : index
    %c0_248 = arith.constant 0 : index
    %238 = vector.load %arg7[%c15_246, %c0_247, %c0_248] : memref<16x2x32xf32, #tpu.memory_space<vmem>>, vector<1x2x32xf32>
    %239 = vector.shape_cast %238 : vector<1x2x32xf32> to vector<2x32xf32>
    %cst_249 = arith.constant dense<0.000000e+00> : vector<2x16xf32>
    %240 = tpu.matmul %239, %131, %cst_249 {dimension_numbers = #tpu.dot_dimension_numbers<[1], [0], [0], [1], [0, 0, 1, 1], [], []>} : vector<2x32xf32>, vector<32x16xf32>, vector<2x16xf32> -> vector<2x16xf32>
    %c15_250 = arith.constant 15 : index
    %c0_251 = arith.constant 0 : index
    %c0_252 = arith.constant 0 : index
    %241 = vector.load %arg8[%c15_250, %c0_251, %c0_252] : memref<16x16x6xf32, #tpu.memory_space<vmem>>, vector<1x16x6xf32>
    %242 = vector.shape_cast %241 : vector<1x16x6xf32> to vector<16x6xf32>
    %cst_253 = arith.constant dense<0.000000e+00> : vector<2x6xf32>
    %243 = tpu.matmul %240, %242, %cst_253 {dimension_numbers = #tpu.dot_dimension_numbers<[1], [0], [0], [1], [0, 0, 1, 1], [], []>} : vector<2x16xf32>, vector<16x6xf32>, vector<2x6xf32> -> vector<2x6xf32>
    %244 = arith.addf %237, %243 : vector<2x6xf32>
    %c0_254 = arith.constant 0 : index
    %c0_255 = arith.constant 0 : index
    %245 = vector.load %arg9[%c0_254, %c0_255] : memref<2x6xf32, #tpu.memory_space<vmem>>, vector<2x6xf32>
    tpu.vector_store %arg9[%c0_254, %c0_255], %244 {strides = array<i32>} : memref<2x6xf32, #tpu.memory_space<vmem>>, vector<2x6xf32>,
    return
  }
  func.func @transform_0(%arg0: i32) -> (i32, i32) {
    %c0_i32 = arith.constant 0 : i32
    %c0_i32_0 = arith.constant 0 : i32
    %c0_i32_1 = arith.constant 0 : i32
    return %c0_i32, %c0_i32_0 : i32, i32
  }
  func.func @transform_1(%arg0: i32) -> (i32, i32) {
    %c0_i32 = arith.constant 0 : i32
    %c0_i32_0 = arith.constant 0 : i32
    %c0_i32_1 = arith.constant 0 : i32
    return %c0_i32, %c0_i32_0 : i32, i32
  }
  func.func @transform_2(%arg0: i32) -> (i32, i32) {
    %c0_i32 = arith.constant 0 : i32
    %c0_i32_0 = arith.constant 0 : i32
    %c0_i32_1 = arith.constant 0 : i32
    return %c0_i32, %c0_i32_0 : i32, i32
  }
  func.func @transform_3(%arg0: i32) -> (i32, i32, i32) {
    %c0_i32 = arith.constant 0 : i32
    %c0_i32_0 = arith.constant 0 : i32
    %c0_i32_1 = arith.constant 0 : i32
    %c0_i32_2 = arith.constant 0 : i32
    return %c0_i32, %c0_i32_0, %c0_i32_1 : i32, i32, i32
  }
  func.func @transform_4(%arg0: i32) -> (i32, i32, i32) {
    %c0_i32 = arith.constant 0 : i32
    %c0_i32_0 = arith.constant 0 : i32
    %c0_i32_1 = arith.constant 0 : i32
    %c0_i32_2 = arith.constant 0 : i32
    return %c0_i32, %c0_i32_0, %c0_i32_1 : i32, i32, i32
  }
  func.func @transform_5(%arg0: i32) -> (i32, i32) {
    %c0_i32 = arith.constant 0 : i32
    %c0_i32_0 = arith.constant 0 : i32
    %c0_i32_1 = arith.constant 0 : i32
    return %c0_i32, %c0_i32_0 : i32, i32
  }
  func.func @transform_6(%arg0: i32) -> (i32, i32, i32) {
    %c0_i32 = arith.constant 0 : i32
    %c0_i32_0 = arith.constant 0 : i32
    %c0_i32_1 = arith.constant 0 : i32
    %c0_i32_2 = arith.constant 0 : i32
    return %c0_i32, %c0_i32_0, %c0_i32_1 : i32, i32, i32
  }
  func.func @transform_7(%arg0: i32) -> (i32, i32, i32) {
    %c0_i32 = arith.constant 0 : i32
    %c0_i32_0 = arith.constant 0 : i32
    %c0_i32_1 = arith.constant 0 : i32
    %c0_i32_2 = arith.constant 0 : i32
    return %c0_i32, %c0_i32_0, %c0_i32_1 : i32, i32, i32
  }
  func.func @transform_8(%arg0: i32) -> (i32, i32) {
    %c0_i32 = arith.constant 0 : i32
    %c0_i32_0 = arith.constant 0 : i32
    %c0_i32_1 = arith.constant 0 : i32
    return %c0_i32, %c0_i32_0 : i32, i32
  }
}

</mosaic_0001>

<bundles_post_ra>
// kernel: discriminator_forward.1
= control target key start
LH: loop header
LB: loop body
LE: loop exit
PB: predicated region body
PF: predicated region fallthrough
CT: control target
= control target key end

     0   :  { %vm54_vm0 = vcmask 130048   ;;  %s9479_s1 = inlined_call_operand.vmem [shape: f32[16,8], index: 1, kind: input, shape index: {}]   ;;  %s9480_s0 = inlined_call_operand.vmem [shape: f32[128,16], index: 0, kind: input, shape index: {}]   ;;  %s9481_s3 = inlined_call_operand.vmem [shape: f32[16,32,128], index: 3, kind: input, shape index: {}]   ;;  %s9482_s2 = inlined_call_operand.vmem [shape: f32[1,8], index: 2, kind: input, shape index: {}]   ;;  %s9483_s4 = inlined_call_operand.vmem [shape: f32[16,8,16], index: 4, kind: input, shape index: {}]   ;;  %s9484_s5 = inlined_call_operand.vmem [shape: f32[1,16], index: 5, kind: input, shape index: {}]   ;;  %s9485_s7 = inlined_call_operand.vmem [shape: f32[16,16,6], index: 7, kind: input, shape index: {}]   ;;  %s9486_s6 = inlined_call_operand.vmem [shape: f32[16,2,32], index: 6, kind: input, shape index: {}]   ;;  %s9487_s8 = inlined_call_operand.vmem [shape: f32[2,6], index: 8, kind: output, shape index: {}]  }
   0x1   :  { %v45_v0 = vld [vmem:[%s9479_s1] sm:$0xff]  ;;  %v46_v1 = vld [vmem:[%s9479_s1 + $0x8] sm:$0xff]  ;;  %v31_v5 = vld [vmem:[%s9480_s0 + $0x10] sm:$0xff] }
   0x2   :  { %v29_v2 = vld [vmem:[%s9480_s0] sm:$0xff]  ;;  %v7665_v3 = vpack.c.bf16 %v46_v1, %v45_v0  ;;  %v30_v4 = vld [vmem:[%s9480_s0 + $0x8] sm:$0xff]  ;;  %v32_v6 = vld [vmem:[%s9480_s0 + $0x18] sm:$0xff] }
   0x3   :  { %6617 = vmatprep.mubr.msk.f32.mxu0 %vm54_vm0, %v29_v2  ;;  %v33_v7 = vld [vmem:[%s9480_s0 + $0x20] sm:$0xff]  ;;  %v34_v8 = vld [vmem:[%s9480_s0 + $0x28] sm:$0xff]  ;;  %v35_v9 = vld [vmem:[%s9480_s0 + $0x30] sm:$0xff] }
   0x4   :  { %7666 = vmatprep.subr.bf16.mxu0 %v7665_v3  ;;  %v36_v10 = vld [vmem:[%s9480_s0 + $0x38] sm:$0xff]  ;;  %v37_v11 = vld [vmem:[%s9480_s0 + $0x40] sm:$0xff]  ;;  %v38_v12 = vld [vmem:[%s9480_s0 + $0x48] sm:$0xff] }
   0x5   :  { %7668 = vmatpush3.bf16.msra.mxu0 %v7665_v3  ;;  %v39_v13 = vld [vmem:[%s9480_s0 + $0x50] sm:$0xff]  ;;  %v40_v14 = vld [vmem:[%s9480_s0 + $0x58] sm:$0xff]  ;;  %v41_v15 = vld [vmem:[%s9480_s0 + $0x60] sm:$0xff] }
   0x6   :  { %v42_v16 = vld [vmem:[%s9480_s0 + $0x68] sm:$0xff]  ;;  %v43_v17 = vld [vmem:[%s9480_s0 + $0x70] sm:$0xff]  ;;  %v44_v18 = vld [vmem:[%s9480_s0 + $0x78] sm:$0xff] }
   0x7   :  { %v5850_v19 = vld [vmem:[%s9481_s3 + $0x20] sm:$0xff] }
   0x8   :  { %6618 = vmatmul.mubr.msk.f32.vlgmr.msra.gmra.mrb[0].mxu0 %vm54_vm0, %v30_v4  ;;  %v296_v20 = vld [vmem:[%s9481_s3] sm:$0xff] }
   0x9   :  { %6620 = vmatprep.mubr.msk.f32.mxu0 %vm54_vm0, %v31_v5  ;;  %6673 = vmatprep.mubr.f32.mxu1 %v296_v20  ;;  %v8545_v21 = vld [vmem:[%s9482_s2] ss:$0 sm:$0xff] }
   0xc   :  { %6621 = vmatmul.mubr.msk.f32.gmra.mrb[2].mxu0 %vm54_vm0, %v32_v6 }
   0xd   :  { %6623 = vmatprep.mubr.msk.f32.mxu0 %vm54_vm0, %v33_v7 }
  0x10   :  { %6624 = vmatmul.mubr.msk.f32.gmra.mrb[4].mxu0 %vm54_vm0, %v34_v8 }
  0x11   :  { %6626 = vmatprep.mubr.msk.f32.mxu0 %vm54_vm0, %v35_v9 }
  0x14   :  { %6627 = vmatmul.mubr.msk.f32.gmra.mrb[6].mxu0 %vm54_vm0, %v36_v10 }
  0x15   :  { %6629 = vmatprep.mubr.msk.f32.mxu0 %vm54_vm0, %v37_v11 }
  0x18   :  { %6630 = vmatmul.mubr.msk.f32.gmra.mrb[8].mxu0 %vm54_vm0, %v38_v12 }
  0x19   :  { %6632 = vmatprep.mubr.msk.f32.mxu0 %vm54_vm0, %v39_v13 }
  0x1c   :  { %6633 = vmatmul.mubr.msk.f32.gmra.mrb[10].mxu0 %vm54_vm0, %v40_v14 }
  0x1d   :  { %6635 = vmatprep.mubr.msk.f32.mxu0 %vm54_vm0, %v41_v15 }
  0x20   :  { %6636 = vmatmul.mubr.msk.f32.gmra.mrb[12].mxu0 %vm54_vm0, %v42_v16 }
  0x21   :  { %6638 = vmatprep.mubr.msk.f32.mxu0 %vm54_vm0, %v43_v17 }
  0x24   :  { %6639 = vmatmul.mubr.msk.f32.gmra.mrb[14].mxu0 %vm54_vm0, %v44_v18 }
  0x25   :  { %6711 = vmatprep.mubr.f32.mxu0 %v5850_v19 }
  0xdb   :  { %v6619_v22 = vpop.f32.mrb[0].mxu0 }
  0xdc   :  { %v175_v23 = vadd.f32 %v6619_v22, %v8545_v21  ;;  %v169_v24 = vpop.f32.mrb[1].mxu0 }
  0xdd   :  { %v170_v25 = vadd.f32 %v8545_v21, %v169_v24 }
  0xde   :  { %vm249_vm1 = vcmp.gt.f32.partialorder %v175_v23, 0.0  ;;  %v265_v26 = vmul.f32 0.01, %v175_v23 }
  0xdf   :  { %vm248_vm2 = vcmp.gt.f32.partialorder %v170_v25, 0.0  ;;  %v264_v27 = vmul.f32 0.01, %v170_v25  ;;  %v6622_v28 = vpop.f32.mrb[2].mxu0 }
  0xe0   :  { %v281_v29 = vsel %vm249_vm1, %v175_v23, %v265_v26  ;;  %v185_v30 = vadd.f32 %v6622_v28, %v8545_v21  ;;  %v179_v31 = vpop.f32.mrb[3].mxu0 }
  0xe1   :  { %v280_v32 = vsel %vm248_vm2, %v170_v25, %v264_v27  ;;  %v180_v33 = vadd.f32 %v8545_v21, %v179_v31  ;;  %v297_v31 = vld [vmem:[%s9481_s3 + $0x8] sm:$0xff]  ;;  %vm478_vm2 = vcmask 64512  }
  0xe2   :  { %v8551_v34 = vpack.c.bf16 %v281_v29, %v280_v32  ;;  %vm251_vm3 = vcmp.gt.f32.partialorder %v185_v30, 0.0  ;;  %v267_v35 = vmul.f32 0.01, %v185_v30  ;;  %v5852_v32 = vld [vmem:[%s9481_s3 + $0x30] sm:$0xff] }
  0xe3   :  { %vm250_vm4 = vcmp.gt.f32.partialorder %v180_v33, 0.0  ;;  %v266_v36 = vmul.f32 0.01, %v180_v33  ;;  %v6625_v37 = vpop.f32.mrb[4].mxu0 }
  0xe4   :  { %v283_v38 = vsel %vm251_vm3, %v185_v30, %v267_v35  ;;  %v195_v39 = vadd.f32 %v6625_v37, %v8545_v21  ;;  %v189_v40 = vpop.f32.mrb[5].mxu0  ;;  %7670 = vmatprep.subr.bf16.mxu1 %v8551_v34  ;;  %7702 = vmatprep.subr.bf16.mxu0 %v8551_v34  ;;  %v5851_v30 = vld [vmem:[%s9481_s3 + $0x28] sm:$0xff]  ;;  %v5853_v35 = vld [vmem:[%s9481_s3 + $0x38] sm:$0xff]  ;;  %v5863_v37 = vld [vmem:[%s9481_s3 + $0x40] sm:$0xff]  ;;  %vm8419_vm3 = vmmov 0  }
  0xe5   :  { %v282_v41 = vsel %vm250_vm4, %v180_v33, %v266_v36  ;;  %v190_v42 = vadd.f32 %v8545_v21, %v189_v40  ;;  %7672 = vmatpush3.bf16.msra.mxu1 %v8551_v34  ;;  %7704 = vmatpush3.bf16.msra.mxu0 %v8551_v34  ;;  %v298_v33 = vld [vmem:[%s9481_s3 + $0x10] sm:$0xff]  ;;  %v299_v36 = vld [vmem:[%s9481_s3 + $0x18] sm:$0xff] }
  0xe6   :  { %v8559_v43 = vpack.c.bf16 %v283_v38, %v282_v41  ;;  %vm253_vm5 = vcmp.gt.f32.partialorder %v195_v39, 0.0  ;;  %v269_v44 = vmul.f32 0.01, %v195_v39  ;;  %v5864_v38 = vld [vmem:[%s9481_s3 + $0x48] sm:$0xff]  ;;  %v5866_v40 = vld [vmem:[%s9481_s3 + $0x58] sm:$0xff]  ;;  %v5881_v41 = vld [vmem:[%s9481_s3 + $0x80] sm:$0xff] }
  0xe7   :  { %vm252_vm6 = vcmp.gt.f32.partialorder %v190_v42, 0.0  ;;  %v268_v45 = vmul.f32 0.01, %v190_v42  ;;  %v6628_v46 = vpop.f32.mrb[6].mxu0 }
  0xe8   :  { %v285_v47 = vsel %vm253_vm5, %v195_v39, %v269_v44  ;;  %v205_v48 = vadd.f32 %v6628_v46, %v8545_v21  ;;  %v199_v49 = vpop.f32.mrb[7].mxu0  ;;  %7674 = vmatprep.subr.bf16.mxu1 %v8559_v43  ;;  %7706 = vmatprep.subr.bf16.mxu0 %v8559_v43  ;;  %v5865_v39 = vld [vmem:[%s9481_s3 + $0x50] sm:$0xff]  ;;  %v5890_v46 = vld [vmem:[%s9481_s3 + $0xa0] sm:$0xff] }
  0xe9   :  { %v284_v50 = vsel %vm252_vm6, %v190_v42, %v268_v45  ;;  %v200_v51 = vadd.f32 %v8545_v21, %v199_v49  ;;  %7676 = vmatpush3.bf16.msra.mxu1 %v8559_v43  ;;  %7708 = vmatpush3.bf16.msra.mxu0 %v8559_v43  ;;  %v5882_v42 = vld [vmem:[%s9481_s3 + $0x88] sm:$0xff]  ;;  %v5883_v44 = vld [vmem:[%s9481_s3 + $0x90] sm:$0xff]  ;;  %v5884_v45 = vld [vmem:[%s9481_s3 + $0x98] sm:$0xff] }
  0xea   :  { %v8567_v52 = vpack.c.bf16 %v285_v47, %v284_v50  ;;  %vm255_vm7 = vcmp.gt.f32.partialorder %v205_v48, 0.0  ;;  %v271_v53 = vmul.f32 0.01, %v205_v48  ;;  %v5854_v47 = vld [vmem:[%s9483_s4 + $0x8] sm:$0xff]  ;;  %v5892_v50 = vld [vmem:[%s9481_s3 + $0xb0] sm:$0xff] }
  0xeb   :  { %vm254_vm8 = vcmp.gt.f32.partialorder %v200_v51, 0.0  ;;  %v270_v54 = vmul.f32 0.01, %v200_v51  ;;  %v6631_v55 = vpop.f32.mrb[8].mxu0  ;;  %v5891_v49 = vld [vmem:[%s9481_s3 + $0xa8] sm:$0xff] }
  0xec   :  { %v287_v56 = vsel %vm255_vm7, %v205_v48, %v271_v53  ;;  %v215_v57 = vadd.f32 %v6631_v55, %v8545_v21  ;;  %v209_v58 = vpop.f32.mrb[9].mxu0  ;;  %7678 = vmatprep.subr.bf16.mxu1 %v8567_v52  ;;  %7710 = vmatprep.subr.bf16.mxu0 %v8567_v52  ;;  %v8709_v48 = vld [vmem:[%s9483_s4] sm:$0xff]  ;;  %v5910_v55 = vld [vmem:[%s9481_s3 + $0xf0] sm:$0xff] }
  0xed   :  { %v286_v59 = vsel %vm254_vm8, %v200_v51, %v270_v54  ;;  %v210_v60 = vadd.f32 %v8545_v21, %v209_v58  ;;  %7680 = vmatpush3.bf16.msra.mxu1 %v8567_v52  ;;  %7712 = vmatpush3.bf16.msra.mxu0 %v8567_v52  ;;  %v5893_v51 = vld [vmem:[%s9481_s3 + $0xb8] sm:$0xff]  ;;  %v5908_v53 = vld [vmem:[%s9481_s3 + $0xe0] sm:$0xff]  ;;  %v5909_v54 = vld [vmem:[%s9481_s3 + $0xe8] sm:$0xff]  ;;  %vm3399_vm8 = vcmask 261120  }
  0xee   :  { %v8575_v61 = vpack.c.bf16 %v287_v56, %v286_v59  ;;  %vm257_vm9 = vcmp.gt.f32.partialorder %v215_v57, 0.0  ;;  %v273_v62 = vmul.f32 0.01, %v215_v57  ;;  %v5911_v56 = vld [vmem:[%s9481_s3 + $0xf8] sm:$0xff]  ;;  %v5927_v58 = vld [vmem:[%s9481_s3 + $0x128] sm:$0xff]  ;;  %v5928_v59 = vld [vmem:[%s9481_s3 + $0x130] sm:$0xff] }
  0xef   :  { %vm256_vm10 = vcmp.gt.f32.partialorder %v210_v60, 0.0  ;;  %v272_v63 = vmul.f32 0.01, %v210_v60  ;;  %v6634_v0 = vpop.f32.mrb[10].mxu0 }
  0xf0   :  { %v289_v1 = vsel %vm257_vm9, %v215_v57, %v273_v62  ;;  %v225_v2 = vadd.f32 %v6634_v0, %v8545_v21  ;;  %v219_v3 = vpop.f32.mrb[11].mxu0  ;;  %7682 = vmatprep.subr.bf16.mxu1 %v8575_v61  ;;  %7714 = vmatprep.subr.bf16.mxu0 %v8575_v61  ;;  %v5926_v57 = vld [vmem:[%s9481_s3 + $0x120] sm:$0xff]  ;;  %v5937_v0 = vld [vmem:[%s9481_s3 + $0x150] sm:$0xff]  ;;  %vm5827_vm9 = vcmask 41984  }
  0xf1   :  { %v288_v4 = vsel %vm256_vm10, %v210_v60, %v272_v63  ;;  %v220_v5 = vadd.f32 %v8545_v21, %v219_v3  ;;  %7684 = vmatpush3.bf16.msra.mxu1 %v8575_v61  ;;  %7716 = vmatpush3.bf16.msra.mxu0 %v8575_v61  ;;  %v5929_v60 = vld [vmem:[%s9481_s3 + $0x138] sm:$0xff]  ;;  %v5935_v62 = vld [vmem:[%s9481_s3 + $0x140] sm:$0xff]  ;;  %v5936_v63 = vld [vmem:[%s9481_s3 + $0x148] sm:$0xff] }
  0xf2   :  { %v8583_v6 = vpack.c.bf16 %v289_v1, %v288_v4  ;;  %vm259_vm11 = vcmp.gt.f32.partialorder %v225_v2, 0.0  ;;  %v275_v7 = vmul.f32 0.01, %v225_v2  ;;  %v5938_v1 = vld [vmem:[%s9481_s3 + $0x158] sm:$0xff] }
  0xf3   :  { %vm258_vm12 = vcmp.gt.f32.partialorder %v220_v5, 0.0  ;;  %v274_v8 = vmul.f32 0.01, %v220_v5  ;;  %v6637_v9 = vpop.f32.mrb[12].mxu0 }
  0xf4   :  { %v291_v10 = vsel %vm259_vm11, %v225_v2, %v275_v7  ;;  %v235_v11 = vadd.f32 %v6637_v9, %v8545_v21  ;;  %v229_v12 = vpop.f32.mrb[13].mxu0  ;;  %7686 = vmatprep.subr.bf16.mxu1 %v8583_v6  ;;  %7718 = vmatprep.subr.bf16.mxu0 %v8583_v6  ;;  %v5953_v2 = vld [vmem:[%s9481_s3 + $0x180] sm:$0xff] }
  0xf5   :  { %v290_v13 = vsel %vm258_vm12, %v220_v5, %v274_v8  ;;  %v230_v14 = vadd.f32 %v8545_v21, %v229_v12  ;;  %7688 = vmatpush3.bf16.msra.mxu1 %v8583_v6  ;;  %7720 = vmatpush3.bf16.msra.mxu0 %v8583_v6  ;;  %v5867_v8 = vld [vmem:[%s9483_s4 + $0x10] sm:$0xff] }
  0xf6   :  { %v8591_v15 = vpack.c.bf16 %v291_v10, %v290_v13  ;;  %vm261_vm13 = vcmp.gt.f32.partialorder %v235_v11, 0.0  ;;  %v277_v16 = vmul.f32 0.01, %v235_v11  ;;  %v5954_v13 = vld [vmem:[%s9481_s3 + $0x188] sm:$0xff] }
  0xf7   :  { %vm260_vm14 = vcmp.gt.f32.partialorder %v230_v14, 0.0  ;;  %v276_v17 = vmul.f32 0.01, %v230_v14  ;;  %v6640_v18 = vpop.f32.mrb[14].mxu0 }
  0xf8   :  { %v293_v19 = vsel %vm261_vm13, %v235_v11, %v277_v16  ;;  %v245_v20 = vadd.f32 %v6640_v18, %v8545_v21  ;;  %v239_v22 = vpop.f32.mrb[15].mxu0  ;;  %7690 = vmatprep.subr.bf16.mxu1 %v8591_v15  ;;  %7722 = vmatprep.subr.bf16.mxu0 %v8591_v15  ;;  %v5956_v16 = vld [vmem:[%s9481_s3 + $0x198] sm:$0xff] }
  0xf9   :  { %v292_v23 = vsel %vm260_vm14, %v230_v14, %v276_v17  ;;  %v240_v24 = vadd.f32 %v8545_v21, %v239_v22  ;;  %7692 = vmatpush3.bf16.msra.mxu1 %v8591_v15  ;;  %7724 = vmatpush3.bf16.msra.mxu0 %v8591_v15  ;;  %v5955_v14 = vld [vmem:[%s9481_s3 + $0x190] sm:$0xff]  ;;  %v5962_v17 = vld [vmem:[%s9481_s3 + $0x1a0] sm:$0xff] }
  0xfa   :  { %v8599_v25 = vpack.c.bf16 %v293_v19, %v292_v23  ;;  %vm263_vm15 = vcmp.gt.f32.partialorder %v245_v20, 0.0  ;;  %v279_v26 = vmul.f32 0.01, %v245_v20  ;;  %v5872_v23 = vld [vmem:[%s9481_s3 + $0x60] sm:$0xff] }
  0xfb   :  { %vm262_vm1 = vcmp.gt.f32.partialorder %v240_v24, 0.0  ;;  %v278_v27 = vmul.f32 0.01, %v240_v24 }
  0xfc   :  { %v295_v28 = vsel %vm263_vm15, %v245_v20, %v279_v26  ;;  %7694 = vmatprep.subr.bf16.mxu1 %v8599_v25  ;;  %7726 = vmatprep.subr.bf16.mxu0 %v8599_v25  ;;  %v5876_v26 = vld [vmem:[%s9483_s4 + $0x18] sm:$0xff] }
  0xfd   :  { %v294_v29 = vsel %vm262_vm1, %v240_v24, %v278_v27  ;;  %7696 = vmatpush3.bf16.msra.mxu1 %v8599_v25  ;;  %7728 = vmatpush3.bf16.msra.mxu0 %v8599_v25  ;;  %v5963_v24 = vld [vmem:[%s9481_s3 + $0x1a8] sm:$0xff] }
  0xfe   :  { %v8605_v21 = vpack.c.bf16 %v295_v28, %v294_v29  ;;  %v5873_v27 = vld [vmem:[%s9481_s3 + $0x68] sm:$0xff]  ;;  %v5874_v29 = vld [vmem:[%s9481_s3 + $0x70] sm:$0xff] }
 0x100   :  { %7698 = vmatprep.subr.bf16.mxu1 %v8605_v21  ;;  %7730 = vmatprep.subr.bf16.mxu0 %v8605_v21 }
 0x101   :  { %7700 = vmatpush3.bf16.msra.mxu1 %v8605_v21  ;;  %7732 = vmatpush3.bf16.msra.mxu0 %v8605_v21 }
 0x102   :  { %7734 = vmatprep.subr.bf16.mxu0 %v8551_v34  ;;  %6717 = vmatprep.subr.mxu1 %v5854_v47 }
 0x104   :  { %6712 = vmatmul.mubr.f32.vlgmr.msra.gmra.mrb[16].mxu0 %v5851_v30  ;;  %6674 = vmatmul.mubr.f32.vlgmr.msra.gmra.mrb[0].mxu1 %v297_v31  ;;  %v5875_v31 = vld [vmem:[%s9481_s3 + $0x78] sm:$0xff] }
 0x105   :  { %7736 = vmatpush3.bf16.msra.mxu0 %v8551_v34  ;;  %6714 = vmatprep.mubr.f32.mxu0 %v5852_v32  ;;  %v5885_v32 = vld [vmem:[%s9483_s4 + $0x20] sm:$0xff] }
 0x106   :  { %7738 = vmatprep.subr.bf16.mxu0 %v8559_v43  ;;  %6676 = vmatprep.mubr.f32.mxu1 %v298_v33 }
 0x107   :  { %6718 = vmatpush3.msra.mxu1 %v5854_v47  ;;  %v5903_v47 = vld [vmem:[%s9483_s4 + $0x30] sm:$0xff] }
 0x108   :  { %6715 = vmatmul.mubr.f32.gmra.mrb[18].mxu0 %v5853_v35  ;;  %6677 = vmatmul.mubr.f32.gmra.mrb[2].mxu1 %v299_v36 }
 0x109   :  { %7740 = vmatpush3.bf16.msra.mxu0 %v8559_v43  ;;  %6765 = vmatprep.mubr.f32.mxu0 %v5863_v37 }
 0x10a   :  { %7742 = vmatprep.subr.bf16.mxu0 %v8567_v52  ;;  %6725 = vmatprep.subr.mxu1 %v8709_v48 }
 0x10d   :  { %7744 = vmatpush3.bf16.msra.mxu0 %v8567_v52 }
 0x10e   :  { %7746 = vmatprep.subr.bf16.mxu0 %v8575_v61 }
 0x111   :  { %7748 = vmatpush3.bf16.msra.mxu0 %v8575_v61 }
 0x112   :  { %7750 = vmatprep.subr.bf16.mxu0 %v8583_v6 }
 0x115   :  { %7752 = vmatpush3.bf16.msra.mxu0 %v8583_v6 }
 0x116   :  { %7754 = vmatprep.subr.bf16.mxu0 %v8591_v15 }
 0x119   :  { %7756 = vmatpush3.bf16.msra.mxu0 %v8591_v15 }
 0x11a   :  { %7758 = vmatprep.subr.bf16.mxu0 %v8599_v25 }
 0x11d   :  { %7760 = vmatpush3.bf16.msra.mxu0 %v8599_v25 }
 0x11e   :  { %7762 = vmatprep.subr.bf16.mxu0 %v8605_v21 }
 0x121   :  { %7764 = vmatpush3.bf16.msra.mxu0 %v8605_v21 }
 0x122   :  { %7798 = vmatprep.subr.bf16.mxu0 %v8551_v34 }
 0x124   :  { %6766 = vmatmul.mubr.f32.vlgmr.msra.gmra.mrb[20].mxu0 %v5864_v38 }
 0x125   :  { %7800 = vmatpush3.bf16.msra.mxu0 %v8551_v34  ;;  %6768 = vmatprep.mubr.f32.mxu0 %v5865_v39 }
 0x126   :  { %7802 = vmatprep.subr.bf16.mxu0 %v8559_v43 }
 0x128   :  { %6769 = vmatmul.mubr.f32.gmra.mrb[22].mxu0 %v5866_v40 }
 0x129   :  { %7804 = vmatpush3.bf16.msra.mxu0 %v8559_v43  ;;  %6857 = vmatprep.mubr.f32.mxu0 %v5881_v41 }
 0x12a   :  { %7806 = vmatprep.subr.bf16.mxu0 %v8567_v52 }
 0x12d   :  { %7808 = vmatpush3.bf16.msra.mxu0 %v8567_v52 }
 0x12e   :  { %7810 = vmatprep.subr.bf16.mxu0 %v8575_v61 }
 0x131   :  { %7812 = vmatpush3.bf16.msra.mxu0 %v8575_v61 }
 0x132   :  { %7814 = vmatprep.subr.bf16.mxu0 %v8583_v6 }
 0x135   :  { %7816 = vmatpush3.bf16.msra.mxu0 %v8583_v6 }
 0x136   :  { %7818 = vmatprep.subr.bf16.mxu0 %v8591_v15 }
 0x139   :  { %7820 = vmatpush3.bf16.msra.mxu0 %v8591_v15 }
 0x13a   :  { %7822 = vmatprep.subr.bf16.mxu0 %v8599_v25 }
 0x13d   :  { %7824 = vmatpush3.bf16.msra.mxu0 %v8599_v25 }
 0x13e   :  { %7826 = vmatprep.subr.bf16.mxu0 %v8605_v21 }
 0x141   :  { %7828 = vmatpush3.bf16.msra.mxu0 %v8605_v21 }
 0x142   :  { %7830 = vmatprep.subr.bf16.mxu0 %v8551_v34 }
 0x144   :  { %6858 = vmatmul.mubr.f32.vlgmr.msra.gmra.mrb[24].mxu0 %v5882_v42  ;;  %v5894_v42 = vld [vmem:[%s9483_s4 + $0x28] sm:$0xff] }
 0x145   :  { %7832 = vmatpush3.bf16.msra.mxu0 %v8551_v34  ;;  %6860 = vmatprep.mubr.f32.mxu0 %v5883_v44 }
 0x146   :  { %7834 = vmatprep.subr.bf16.mxu0 %v8559_v43 }
 0x148   :  { %6861 = vmatmul.mubr.f32.gmra.mrb[26].mxu0 %v5884_v45 }
 0x149   :  { %7836 = vmatpush3.bf16.msra.mxu0 %v8559_v43  ;;  %6903 = vmatprep.mubr.f32.mxu0 %v5890_v46  ;;  %v5899_v46 = vld [vmem:[%s9481_s3 + $0xc0] sm:$0xff] }
 0x14a   :  { %7838 = vmatprep.subr.bf16.mxu0 %v8567_v52 }
 0x14d   :  { %7840 = vmatpush3.bf16.msra.mxu0 %v8567_v52 }
 0x14e   :  { %7842 = vmatprep.subr.bf16.mxu0 %v8575_v61 }
 0x151   :  { %7844 = vmatpush3.bf16.msra.mxu0 %v8575_v61 }
 0x152   :  { %7846 = vmatprep.subr.bf16.mxu0 %v8583_v6 }
 0x155   :  { %7848 = vmatpush3.bf16.msra.mxu0 %v8583_v6 }
 0x156   :  { %7850 = vmatprep.subr.bf16.mxu0 %v8591_v15 }
 0x159   :  { %7852 = vmatpush3.bf16.msra.mxu0 %v8591_v15 }
 0x15a   :  { %7854 = vmatprep.subr.bf16.mxu0 %v8599_v25 }
 0x15d   :  { %7856 = vmatpush3.bf16.msra.mxu0 %v8599_v25 }
 0x15e   :  { %7858 = vmatprep.subr.bf16.mxu0 %v8605_v21 }
 0x161   :  { %7860 = vmatpush3.bf16.msra.mxu0 %v8605_v21 }
 0x162   :  { %7894 = vmatprep.subr.bf16.mxu0 %v8551_v34 }
 0x164   :  { %6904 = vmatmul.mubr.f32.vlgmr.msra.gmra.mrb[28].mxu0 %v5891_v49  ;;  %v5901_v49 = vld [vmem:[%s9481_s3 + $0xd0] sm:$0xff] }
 0x165   :  { %7896 = vmatpush3.bf16.msra.mxu0 %v8551_v34  ;;  %6906 = vmatprep.mubr.f32.mxu0 %v5892_v50  ;;  %v5902_v50 = vld [vmem:[%s9481_s3 + $0xd8] sm:$0xff] }
 0x166   :  { %7898 = vmatprep.subr.bf16.mxu0 %v8559_v43 }
 0x168   :  { %6907 = vmatmul.mubr.f32.gmra.mrb[30].mxu0 %v5893_v51  ;;  %v5912_v51 = vld [vmem:[%s9483_s4 + $0x38] sm:$0xff] }
 0x169   :  { %7900 = vmatpush3.bf16.msra.mxu0 %v8559_v43  ;;  %6995 = vmatprep.mubr.f32.mxu0 %v5908_v53 }
 0x16a   :  { %7902 = vmatprep.subr.bf16.mxu0 %v8567_v52 }
 0x16d   :  { %7904 = vmatpush3.bf16.msra.mxu0 %v8567_v52 }
 0x16e   :  { %7906 = vmatprep.subr.bf16.mxu0 %v8575_v61 }
 0x171   :  { %7908 = vmatpush3.bf16.msra.mxu0 %v8575_v61 }
 0x172   :  { %7910 = vmatprep.subr.bf16.mxu0 %v8583_v6 }
 0x175   :  { %7912 = vmatpush3.bf16.msra.mxu0 %v8583_v6 }
 0x176   :  { %7914 = vmatprep.subr.bf16.mxu0 %v8591_v15 }
 0x179   :  { %7916 = vmatpush3.bf16.msra.mxu0 %v8591_v15 }
 0x17a   :  { %7918 = vmatprep.subr.bf16.mxu0 %v8599_v25 }
 0x17d   :  { %7920 = vmatpush3.bf16.msra.mxu0 %v8599_v25 }
 0x17e   :  { %7922 = vmatprep.subr.bf16.mxu0 %v8605_v21 }
 0x181   :  { %7924 = vmatpush3.bf16.msra.mxu0 %v8605_v21 }
 0x182   :  { %7958 = vmatprep.subr.bf16.mxu0 %v8551_v34 }
 0x184   :  { %6996 = vmatmul.mubr.f32.vlgmr.msra.gmra.mrb[32].mxu0 %v5909_v54 }
 0x185   :  { %7960 = vmatpush3.bf16.msra.mxu0 %v8551_v34  ;;  %6998 = vmatprep.mubr.f32.mxu0 %v5910_v55 }
 0x186   :  { %7962 = vmatprep.subr.bf16.mxu0 %v8559_v43 }
 0x188   :  { %6999 = vmatmul.mubr.f32.gmra.mrb[34].mxu0 %v5911_v56 }
 0x189   :  { %7964 = vmatpush3.bf16.msra.mxu0 %v8559_v43  ;;  %7087 = vmatprep.mubr.f32.mxu0 %v5926_v57 }
 0x18a   :  { %7966 = vmatprep.subr.bf16.mxu0 %v8567_v52 }
 0x18d   :  { %7968 = vmatpush3.bf16.msra.mxu0 %v8567_v52 }
 0x18e   :  { %7970 = vmatprep.subr.bf16.mxu0 %v8575_v61 }
 0x191   :  { %7972 = vmatpush3.bf16.msra.mxu0 %v8575_v61 }
 0x192   :  { %7974 = vmatprep.subr.bf16.mxu0 %v8583_v6 }
 0x195   :  { %7976 = vmatpush3.bf16.msra.mxu0 %v8583_v6 }
 0x196   :  { %7978 = vmatprep.subr.bf16.mxu0 %v8591_v15 }
 0x199   :  { %7980 = vmatpush3.bf16.msra.mxu0 %v8591_v15 }
 0x19a   :  { %7982 = vmatprep.subr.bf16.mxu0 %v8599_v25 }
 0x19d   :  { %7984 = vmatpush3.bf16.msra.mxu0 %v8599_v25 }
 0x19e   :  { %7986 = vmatprep.subr.bf16.mxu0 %v8605_v21 }
 0x1a1   :  { %7988 = vmatpush3.bf16.msra.mxu0 %v8605_v21 }
 0x1a2   :  { %7990 = vmatprep.subr.bf16.mxu0 %v8551_v34 }
 0x1a4   :  { %7088 = vmatmul.mubr.f32.vlgmr.msra.gmra.mrb[36].mxu0 %v5927_v58 }
 0x1a5   :  { %7992 = vmatpush3.bf16.msra.mxu0 %v8551_v34  ;;  %7090 = vmatprep.mubr.f32.mxu0 %v5928_v59 }
 0x1a6   :  { %7994 = vmatprep.subr.bf16.mxu0 %v8559_v43 }
 0x1a8   :  { %7091 = vmatmul.mubr.f32.gmra.mrb[38].mxu0 %v5929_v60 }
 0x1a9   :  { %7996 = vmatpush3.bf16.msra.mxu0 %v8559_v43  ;;  %7133 = vmatprep.mubr.f32.mxu0 %v5935_v62 }
 0x1aa   :  { %7998 = vmatprep.subr.bf16.mxu0 %v8567_v52 }
 0x1ad   :  { %8000 = vmatpush3.bf16.msra.mxu0 %v8567_v52 }
 0x1ae   :  { %8002 = vmatprep.subr.bf16.mxu0 %v8575_v61 }
 0x1b1   :  { %8004 = vmatpush3.bf16.msra.mxu0 %v8575_v61 }
 0x1b2   :  { %8006 = vmatprep.subr.bf16.mxu0 %v8583_v6 }
 0x1b5   :  { %8008 = vmatpush3.bf16.msra.mxu0 %v8583_v6 }
 0x1b6   :  { %8010 = vmatprep.subr.bf16.mxu0 %v8591_v15 }
 0x1b9   :  { %8012 = vmatpush3.bf16.msra.mxu0 %v8591_v15 }
 0x1ba   :  { %8014 = vmatprep.subr.bf16.mxu0 %v8599_v25 }
 0x1bd   :  { %8016 = vmatpush3.bf16.msra.mxu0 %v8599_v25 }
 0x1be   :  { %8018 = vmatprep.subr.bf16.mxu0 %v8605_v21 }
 0x1c1   :  { %8020 = vmatpush3.bf16.msra.mxu0 %v8605_v21 }
 0x1c2   :  { %8054 = vmatprep.subr.bf16.mxu0 %v8551_v34 }
 0x1c4   :  { %7134 = vmatmul.mubr.f32.vlgmr.msra.gmra.mrb[40].mxu0 %v5936_v63 }
 0x1c5   :  { %8056 = vmatpush3.bf16.msra.mxu0 %v8551_v34  ;;  %7136 = vmatprep.mubr.f32.mxu0 %v5937_v0  ;;  %v5917_v0 = vld [vmem:[%s9481_s3 + $0x100] sm:$0xff] }
 0x1c6   :  { %8058 = vmatprep.subr.bf16.mxu0 %v8559_v43 }
 0x1c8   :  { %7137 = vmatmul.mubr.f32.gmra.mrb[42].mxu0 %v5938_v1  ;;  %v5921_v1 = vld [vmem:[%s9483_s4 + $0x40] sm:$0xff] }
 0x1c9   :  { %8060 = vmatpush3.bf16.msra.mxu0 %v8559_v43  ;;  %7225 = vmatprep.mubr.f32.mxu0 %v5953_v2  ;;  %v5918_v2 = vld [vmem:[%s9481_s3 + $0x108] sm:$0xff] }
 0x1ca   :  { %8062 = vmatprep.subr.bf16.mxu0 %v8567_v52 }
 0x1cd   :  { %8064 = vmatpush3.bf16.msra.mxu0 %v8567_v52 }
 0x1ce   :  { %8066 = vmatprep.subr.bf16.mxu0 %v8575_v61 }
 0x1d1   :  { %8068 = vmatpush3.bf16.msra.mxu0 %v8575_v61 }
 0x1d2   :  { %8070 = vmatprep.subr.bf16.mxu0 %v8583_v6 }
 0x1d5   :  { %8072 = vmatpush3.bf16.msra.mxu0 %v8583_v6 }
 0x1d6   :  { %8074 = vmatprep.subr.bf16.mxu0 %v8591_v15 }
 0x1d7   :  { %v6713_v3 = vpop.f32.mrb[16].mxu0  ;;  %v6675_v4 = vpop.f32.mrb[0].mxu1 }
 0x1d8   :  { %v457_v5 = vpop.f32.mrb[17].mxu0  ;;  %v366_v7 = vpop.f32.mrb[1].mxu1 }
 0x1d9   :  { %6719 = vmatprep.mubr.msk.f32.mxu1 %vm478_vm2, %v457_v5  ;;  %8076 = vmatpush3.bf16.msra.mxu0 %v8591_v15  ;;  %v5930_v5 = vld [vmem:[%s9483_s4 + $0x48] sm:$0xff] }
 0x1da   :  { %6720 = vmatmul.mubr.msk.f32.vlgmr.msra.gmra.mrb[4].mxu1 %vm478_vm2, %v6713_v3  ;;  %8078 = vmatprep.subr.bf16.mxu0 %v8599_v25  ;;  %v5919_v3 = vld [vmem:[%s9481_s3 + $0x110] sm:$0xff] }
 0x1db   :  { %v6716_v9 = vpop.f32.mrb[18].mxu0  ;;  %6726 = vmatpush3.msra.mxu1 %v8709_v48  ;;  %v6678_v10 = vpop.f32.mrb[2].mxu1  ;;  %v5900_v48 = vld [vmem:[%s9481_s3 + $0xc8] sm:$0xff] }
 0x1dc   :  { %v467_v11 = vpop.f32.mrb[19].mxu0  ;;  %6771 = vmatprep.subr.mxu1 %v5867_v8  ;;  %v376_v12 = vpop.f32.mrb[3].mxu1 }
 0x1dd   :  { %6722 = vmatprep.mubr.msk.f32.mxu1 %vm478_vm2, %v467_v11  ;;  %8080 = vmatpush3.bf16.msra.mxu0 %v8599_v25 }
 0x1de   :  { %6723 = vmatmul.mubr.msk.f32.gmra.mrb[6].mxu1 %vm478_vm2, %v6716_v9  ;;  %8082 = vmatprep.subr.bf16.mxu0 %v8605_v21 }
 0x1df   :  { %6727 = vmatprep.mubr.msk.f32.mxu1 %vm478_vm2, %v366_v7 }
 0x1e1   :  { %8084 = vmatpush3.bf16.msra.mxu0 %v8605_v21 }
 0x1e2   :  { %6728 = vmatmul.mubr.msk.f32.vlgmr.msra.gmra.mrb[4].mxu1 %vm478_vm2, %v6675_v4  ;;  %8086 = vmatprep.subr.bf16.mxu0 %v8551_v34  ;;  %v5920_v4 = vld [vmem:[%s9481_s3 + $0x118] sm:$0xff] }
 0x1e3   :  { %6772 = vmatpush3.msra.mxu1 %v5867_v8  ;;  %6730 = vmatprep.mubr.msk.f32.mxu1 %vm478_vm2, %v376_v12 }
 0x1e4   :  { %7766 = vmatprep.subr.bf16.mxu1 %v8551_v34  ;;  %7226 = vmatmul.mubr.f32.vlgmr.msra.gmra.mrb[44].mxu0 %v5954_v13  ;;  %v5964_v13 = vld [vmem:[%s9481_s3 + $0x1b0] sm:$0xff] }
 0x1e5   :  { %8088 = vmatpush3.bf16.msra.mxu0 %v8551_v34  ;;  %7228 = vmatprep.mubr.f32.mxu0 %v5955_v14  ;;  %v5965_v14 = vld [vmem:[%s9481_s3 + $0x1b8] sm:$0xff] }
 0x1e6   :  { %8090 = vmatprep.subr.bf16.mxu0 %v8559_v43  ;;  %6731 = vmatmul.mubr.msk.f32.gmra.mrb[6].mxu1 %vm478_vm2, %v6678_v10 }
 0x1e8   :  { %7229 = vmatmul.mubr.f32.gmra.mrb[46].mxu0 %v5956_v16 }
 0x1e9   :  { %8092 = vmatpush3.bf16.msra.mxu0 %v8559_v43  ;;  %7271 = vmatprep.mubr.f32.mxu0 %v5962_v17 }
 0x1ea   :  { %8094 = vmatprep.subr.bf16.mxu0 %v8567_v52 }
 0x1ed   :  { %8096 = vmatpush3.bf16.msra.mxu0 %v8567_v52 }
 0x1ee   :  { %8098 = vmatprep.subr.bf16.mxu0 %v8575_v61 }
 0x1f1   :  { %8100 = vmatpush3.bf16.msra.mxu0 %v8575_v61 }
 0x1f2   :  { %8102 = vmatprep.subr.bf16.mxu0 %v8583_v6 }
 0x1f5   :  { %8104 = vmatpush3.bf16.msra.mxu0 %v8583_v6 }
 0x1f6   :  { %8106 = vmatprep.subr.bf16.mxu0 %v8591_v15 }
 0x1f7   :  { %v6767_v18 = vpop.f32.mrb[20].mxu0 }
 0x1f8   :  { %v744_v19 = vpop.f32.mrb[21].mxu0 }
 0x1f9   :  { %6773 = vmatprep.mubr.msk.f32.mxu1 %vm478_vm2, %v744_v19  ;;  %8108 = vmatpush3.bf16.msra.mxu0 %v8591_v15 }
 0x1fa   :  { %6774 = vmatmul.mubr.msk.f32.vlgmr.msra.gmra.mrb[4].mxu1 %vm478_vm2, %v6767_v18  ;;  %8110 = vmatprep.subr.bf16.mxu0 %v8599_v25 }
 0x1fb   :  { %7768 = vmatpush3.bf16.msra.mxu1 %v8551_v34  ;;  %v6770_v20 = vpop.f32.mrb[22].mxu0 }
 0x1fc   :  { %7770 = vmatprep.subr.bf16.mxu1 %v8559_v43  ;;  %v754_v22 = vpop.f32.mrb[23].mxu0 }
 0x1fd   :  { %8112 = vmatpush3.bf16.msra.mxu0 %v8599_v25  ;;  %6776 = vmatprep.mubr.msk.f32.mxu1 %vm478_vm2, %v754_v22 }
 0x1fe   :  { %8114 = vmatprep.subr.bf16.mxu0 %v8605_v21  ;;  %6777 = vmatmul.mubr.msk.f32.gmra.mrb[6].mxu1 %vm478_vm2, %v6770_v20  ;;  %v5939_v20 = vld [vmem:[%s9483_s4 + $0x50] sm:$0xff] }
 0x1ff   :  { %7772 = vmatpush3.bf16.msra.mxu1 %v8559_v43  ;;  %6811 = vmatprep.mubr.f32.mxu1 %v5872_v23 }
 0x200   :  { %7774 = vmatprep.subr.bf16.mxu1 %v8567_v52 }
 0x201   :  { %8116 = vmatpush3.bf16.msra.mxu0 %v8605_v21 }
 0x202   :  { %8150 = vmatprep.subr.bf16.mxu0 %v8551_v34 }
 0x203   :  { %7776 = vmatpush3.bf16.msra.mxu1 %v8567_v52 }
 0x204   :  { %7778 = vmatprep.subr.bf16.mxu1 %v8575_v61  ;;  %7272 = vmatmul.mubr.f32.vlgmr.msra.gmra.mrb[48].mxu0 %v5963_v24  ;;  %v5944_v24 = vld [vmem:[%s9481_s3 + $0x160] sm:$0xff] }
 0x205   :  { %8152 = vmatpush3.bf16.msra.mxu0 %v8551_v34  ;;  %7274 = vmatprep.mubr.f32.mxu0 %v5964_v13 }
 0x206   :  { %8154 = vmatprep.subr.bf16.mxu0 %v8559_v43 }
 0x207   :  { %7780 = vmatpush3.bf16.msra.mxu1 %v8575_v61 }
 0x208   :  { %7782 = vmatprep.subr.bf16.mxu1 %v8583_v6  ;;  %7275 = vmatmul.mubr.f32.gmra.mrb[50].mxu0 %v5965_v14  ;;  %v5993_v14 = vld [vmem:[%s9485_s7 + $0x10] sm:$0xff] }
 0x209   :  { %8156 = vmatpush3.bf16.msra.mxu0 %v8559_v43 }
 0x20a   :  { %8158 = vmatprep.subr.bf16.mxu0 %v8567_v52 }
 0x20b   :  { %7784 = vmatpush3.bf16.msra.mxu1 %v8583_v6 }
 0x20c   :  { %7786 = vmatprep.subr.bf16.mxu1 %v8591_v15 }
 0x20d   :  { %8160 = vmatpush3.bf16.msra.mxu0 %v8567_v52 }
 0x20e   :  { %8162 = vmatprep.subr.bf16.mxu0 %v8575_v61 }
 0x20f   :  { %7788 = vmatpush3.bf16.msra.mxu1 %v8591_v15 }
 0x210   :  { %7790 = vmatprep.subr.bf16.mxu1 %v8599_v25 }
 0x211   :  { %8164 = vmatpush3.bf16.msra.mxu0 %v8575_v61 }
 0x212   :  { %8166 = vmatprep.subr.bf16.mxu0 %v8583_v6 }
 0x213   :  { %7792 = vmatpush3.bf16.msra.mxu1 %v8599_v25 }
 0x214   :  { %7794 = vmatprep.subr.bf16.mxu1 %v8605_v21 }
 0x215   :  { %8168 = vmatpush3.bf16.msra.mxu0 %v8583_v6 }
 0x216   :  { %8170 = vmatprep.subr.bf16.mxu0 %v8591_v15 }
 0x217   :  { %7796 = vmatpush3.bf16.msra.mxu1 %v8605_v21  ;;  %v6859_v28 = vpop.f32.mrb[24].mxu0 }
 0x218   :  { %v1130_v30 = vpop.f32.mrb[25].mxu0  ;;  %6817 = vmatprep.subr.mxu1 %v5876_v26 }
 0x219   :  { %8172 = vmatpush3.bf16.msra.mxu0 %v8591_v15 }
 0x21a   :  { %6812 = vmatmul.mubr.f32.vlgmr.msra.gmra.mrb[8].mxu1 %v5873_v27  ;;  %8174 = vmatprep.subr.bf16.mxu0 %v8599_v25  ;;  %v5945_v27 = vld [vmem:[%s9481_s3 + $0x168] sm:$0xff] }
 0x21b   :  { %6814 = vmatprep.mubr.f32.mxu1 %v5874_v29  ;;  %6818 = vmatpush3.msra.mxu1 %v5876_v26  ;;  %v6862_v33 = vpop.f32.mrb[26].mxu0  ;;  %v5948_v26 = vld [vmem:[%s9483_s4 + $0x58] sm:$0xff] }
 0x21c   :  { %6863 = vmatprep.subr.mxu1 %v5885_v32  ;;  %v1140_v35 = vpop.f32.mrb[27].mxu0  ;;  %v5947_v29 = vld [vmem:[%s9481_s3 + $0x178] sm:$0xff] }
 0x21d   :  { %8176 = vmatpush3.bf16.msra.mxu0 %v8599_v25 }
 0x21e   :  { %6815 = vmatmul.mubr.f32.gmra.mrb[10].mxu1 %v5875_v31  ;;  %8178 = vmatprep.subr.bf16.mxu0 %v8605_v21 }
 0x221   :  { %8180 = vmatpush3.bf16.msra.mxu0 %v8605_v21 }
 0x237   :  { %v6905_v36 = vpop.f32.mrb[28].mxu0 }
 0x238   :  { %v1323_v37 = vpop.f32.mrb[29].mxu0 }
 0x23b   :  { %v6908_v38 = vpop.f32.mrb[30].mxu0 }
 0x23c   :  { %v1333_v39 = vpop.f32.mrb[31].mxu0 }
 0x257   :  { %v6997_v53 = vpop.f32.mrb[32].mxu0 }
 0x258   :  { %v1709_v54 = vpop.f32.mrb[33].mxu0 }
 0x25b   :  { %v7000_v55 = vpop.f32.mrb[34].mxu0 }
 0x25c   :  { %v1719_v56 = vpop.f32.mrb[35].mxu0 }
 0x277   :  { %v8971_v57 = vpop.f32.mrb[36].mxu0 }
 0x278   :  { %v8973_v58 = vpop.f32.mrb[37].mxu0 }
 0x27b   :  { %v7092_v7 = vpop.f32.mrb[38].mxu0 }
 0x27c   :  { %v2105_v8 = vpop.f32.mrb[39].mxu0 }
 0x297   :  { %v7135_v9 = vpop.f32.mrb[40].mxu0 }
 0x298   :  { %v2288_v10 = vpop.f32.mrb[41].mxu0 }
 0x29b   :  { %v7138_v11 = vpop.f32.mrb[42].mxu0 }
 0x29c   :  { %v2298_v12 = vpop.f32.mrb[43].mxu0 }
 0x2b7   :  { %v9023_v16 = vpop.f32.mrb[44].mxu0 }
 0x2b8   :  { %v9025_v17 = vpop.f32.mrb[45].mxu0 }
 0x2bb   :  { %v7230_v31 = vpop.f32.mrb[46].mxu0 }
 0x2ed   :  { %v6813_v40 = vpop.f32.mrb[8].mxu1 }
 0x2ee   :  { %v937_v41 = vpop.f32.mrb[9].mxu1 }
 0x2ef   :  { %6819 = vmatprep.mubr.msk.f32.mxu1 %vm478_vm2, %v937_v41  ;;  %v5983_v41 = vld [vmem:[%s9481_s3 + $0x1f8] sm:$0xff] }
 0x2f0   :  { %6820 = vmatmul.mubr.msk.f32.vlgmr.msra.gmra.mrb[4].mxu1 %vm478_vm2, %v6813_v40  ;;  %v5982_v40 = vld [vmem:[%s9481_s3 + $0x1f0] sm:$0xff] }
 0x2f1   :  { %v6816_v44 = vpop.f32.mrb[10].mxu1  ;;  %6864 = vmatpush3.msra.mxu1 %v5885_v32  ;;  %v2684_v32 = vpop.f32.mrb[47].mxu0 }
 0x2f2   :  { %v947_v45 = vpop.f32.mrb[11].mxu1  ;;  %6909 = vmatprep.subr.mxu1 %v5894_v42 }
 0x2f3   :  { %6822 = vmatprep.mubr.msk.f32.mxu1 %vm478_vm2, %v947_v45  ;;  %v5966_v45 = vld [vmem:[%s9483_s4 + $0x68] sm:$0xff] }
 0x2f4   :  { %6823 = vmatmul.mubr.msk.f32.gmra.mrb[6].mxu1 %vm478_vm2, %v6816_v44 }
 0x2f5   :  { %6865 = vmatprep.mubr.msk.f32.mxu1 %vm478_vm2, %v1130_v30  ;;  %v5957_v30 = vld [vmem:[%s9483_s4 + $0x60] sm:$0xff] }
 0x2f8   :  { %6866 = vmatmul.mubr.msk.f32.vlgmr.msra.gmra.mrb[4].mxu1 %vm478_vm2, %v6859_v28  ;;  %v5946_v28 = vld [vmem:[%s9481_s3 + $0x170] sm:$0xff] }
 0x2f9   :  { %6910 = vmatpush3.msra.mxu1 %v5894_v42  ;;  %6868 = vmatprep.mubr.msk.f32.mxu1 %vm478_vm2, %v1140_v35 }
 0x2fa   :  { %7862 = vmatprep.subr.bf16.mxu1 %v8551_v34 }
 0x2fc   :  { %6869 = vmatmul.mubr.msk.f32.gmra.mrb[6].mxu1 %vm478_vm2, %v6862_v33  ;;  %v7273_v33 = vpop.f32.mrb[48].mxu0 }
 0x2fd   :  { %6911 = vmatprep.mubr.msk.f32.mxu1 %vm478_vm2, %v1323_v37  ;;  %v2867_v35 = vpop.f32.mrb[49].mxu0 }
 0x300   :  { %6912 = vmatmul.mubr.msk.f32.vlgmr.msra.gmra.mrb[4].mxu1 %vm478_vm2, %v6905_v36  ;;  %v7276_v36 = vpop.f32.mrb[50].mxu0 }
 0x301   :  { %7864 = vmatpush3.bf16.msra.mxu1 %v8551_v34  ;;  %6914 = vmatprep.mubr.msk.f32.mxu1 %vm478_vm2, %v1333_v39  ;;  %v2877_v37 = vpop.f32.mrb[51].mxu0  ;;  %v5981_v39 = vld [vmem:[%s9481_s3 + $0x1e8] sm:$0xff] }
 0x302   :  { %7866 = vmatprep.subr.bf16.mxu1 %v8559_v43 }
 0x304   :  { %6915 = vmatmul.mubr.msk.f32.gmra.mrb[6].mxu1 %vm478_vm2, %v6908_v38  ;;  %v5980_v38 = vld [vmem:[%s9481_s3 + $0x1e0] sm:$0xff] }
 0x305   :  { %7868 = vmatpush3.bf16.msra.mxu1 %v8559_v43  ;;  %6949 = vmatprep.mubr.f32.mxu1 %v5899_v46 }
 0x306   :  { %7870 = vmatprep.subr.bf16.mxu1 %v8567_v52  ;;  %7363 = vmatprep.mubr.f32.mxu0 %v5980_v38 }
 0x307   :  { %7364 = vmatmul.mubr.f32.vlgmr.msra.gmra.mrb[52].mxu0 %v5981_v39 }
 0x308   :  { %7366 = vmatprep.mubr.f32.mxu0 %v5982_v40  ;;  %v5999_v40 = vld [vmem:[%s9485_s7 + $0x20] sm:$0xff] }
 0x309   :  { %7872 = vmatpush3.bf16.msra.mxu1 %v8567_v52 }
 0x30a   :  { %7874 = vmatprep.subr.bf16.mxu1 %v8575_v61 }
 0x30b   :  { %7367 = vmatmul.mubr.f32.gmra.mrb[54].mxu0 %v5983_v41  ;;  %v6000_v41 = vld [vmem:[%s9485_s7 + $0x28] sm:$0xff] }
 0x30d   :  { %7876 = vmatpush3.bf16.msra.mxu1 %v8575_v61 }
 0x30e   :  { %7878 = vmatprep.subr.bf16.mxu1 %v8583_v6 }
 0x311   :  { %7880 = vmatpush3.bf16.msra.mxu1 %v8583_v6 }
 0x312   :  { %7882 = vmatprep.subr.bf16.mxu1 %v8591_v15 }
 0x315   :  { %7884 = vmatpush3.bf16.msra.mxu1 %v8591_v15 }
 0x316   :  { %7886 = vmatprep.subr.bf16.mxu1 %v8599_v25 }
 0x319   :  { %7888 = vmatpush3.bf16.msra.mxu1 %v8599_v25 }
 0x31a   :  { %7890 = vmatprep.subr.bf16.mxu1 %v8605_v21 }
 0x31d   :  { %7892 = vmatpush3.bf16.msra.mxu1 %v8605_v21 }
 0x31e   :  { %6955 = vmatprep.subr.mxu1 %v5903_v47 }
 0x320   :  { %6950 = vmatmul.mubr.f32.vlgmr.msra.gmra.mrb[12].mxu1 %v5900_v48  ;;  %v5971_v48 = vld [vmem:[%s9481_s3 + $0x1c0] sm:$0xff] }
 0x321   :  { %6952 = vmatprep.mubr.f32.mxu1 %v5901_v49  ;;  %6956 = vmatpush3.msra.mxu1 %v5903_v47 }
 0x322   :  { %7001 = vmatprep.subr.mxu1 %v5912_v51 }
 0x324   :  { %6953 = vmatmul.mubr.f32.gmra.mrb[14].mxu1 %v5902_v50 }
 0x3f3   :  { %v6951_v59 = vpop.f32.mrb[12].mxu1 }
 0x3f4   :  { %v1516_v60 = vpop.f32.mrb[13].mxu1 }
 0x3f5   :  { %6957 = vmatprep.mubr.msk.f32.mxu1 %vm478_vm2, %v1516_v60 }
 0x3f6   :  { %6958 = vmatmul.mubr.msk.f32.vlgmr.msra.gmra.mrb[4].mxu1 %vm478_vm2, %v6951_v59 }
 0x3f7   :  { %7002 = vmatpush3.msra.mxu1 %v5912_v51  ;;  %v6954_v62 = vpop.f32.mrb[14].mxu1 }
 0x3f8   :  { %7926 = vmatprep.subr.bf16.mxu1 %v8551_v34  ;;  %v1526_v63 = vpop.f32.mrb[15].mxu1 }
 0x3f9   :  { %6960 = vmatprep.mubr.msk.f32.mxu1 %vm478_vm2, %v1526_v63 }
 0x3fa   :  { %6961 = vmatmul.mubr.msk.f32.gmra.mrb[6].mxu1 %vm478_vm2, %v6954_v62 }
 0x3fb   :  { %7003 = vmatprep.mubr.msk.f32.mxu1 %vm478_vm2, %v1709_v54 }
 0x3fe   :  { %7004 = vmatmul.mubr.msk.f32.vlgmr.msra.gmra.mrb[4].mxu1 %vm478_vm2, %v6997_v53 }
 0x3ff   :  { %7928 = vmatpush3.bf16.msra.mxu1 %v8551_v34  ;;  %7006 = vmatprep.mubr.msk.f32.mxu1 %vm478_vm2, %v1719_v56  ;;  %v8420_v56 = vmov 0.0  }
 0x400   :  { %7930 = vmatprep.subr.bf16.mxu1 %v8559_v43  ;;  %7396 = vmatprep.mubr.msk.f32.mxu0 %vm8419_vm3, %v8420_v56 }
 0x402   :  { %7007 = vmatmul.mubr.msk.f32.gmra.mrb[6].mxu1 %vm478_vm2, %v7000_v55  ;;  %v8418_v55 = vmov 0.0|0.0  }
 0x403   :  { %7932 = vmatpush3.bf16.msra.mxu1 %v8559_v43  ;;  %7041 = vmatprep.mubr.f32.mxu1 %v5917_v0 }
 0x404   :  { %7934 = vmatprep.subr.bf16.mxu1 %v8567_v52  ;;  %8187 = vmatprep.subr.bf16.mxu0 %v8418_v55 }
 0x407   :  { %7936 = vmatpush3.bf16.msra.mxu1 %v8567_v52 }
 0x408   :  { %7938 = vmatprep.subr.bf16.mxu1 %v8575_v61 }
 0x40b   :  { %7940 = vmatpush3.bf16.msra.mxu1 %v8575_v61 }
 0x40c   :  { %7942 = vmatprep.subr.bf16.mxu1 %v8583_v6 }
 0x40f   :  { %7944 = vmatpush3.bf16.msra.mxu1 %v8583_v6 }
 0x410   :  { %7946 = vmatprep.subr.bf16.mxu1 %v8591_v15 }
 0x413   :  { %7948 = vmatpush3.bf16.msra.mxu1 %v8591_v15 }
 0x414   :  { %7950 = vmatprep.subr.bf16.mxu1 %v8599_v25 }
 0x417   :  { %7952 = vmatpush3.bf16.msra.mxu1 %v8599_v25 }
 0x418   :  { %7954 = vmatprep.subr.bf16.mxu1 %v8605_v21 }
 0x41b   :  { %7956 = vmatpush3.bf16.msra.mxu1 %v8605_v21 }
 0x41c   :  { %7047 = vmatprep.subr.mxu1 %v5921_v1 }
 0x41e   :  { %7042 = vmatmul.mubr.f32.vlgmr.msra.gmra.mrb[16].mxu1 %v5918_v2 }
 0x41f   :  { %7044 = vmatprep.mubr.f32.mxu1 %v5919_v3  ;;  %7048 = vmatpush3.msra.mxu1 %v5921_v1 }
 0x420   :  { %7093 = vmatprep.subr.mxu1 %v5930_v5 }
 0x422   :  { %7045 = vmatmul.mubr.f32.gmra.mrb[18].mxu1 %v5920_v4 }
 0x4f1   :  { %v7043_v18 = vpop.f32.mrb[16].mxu1 }
 0x4f2   :  { %v1902_v19 = vpop.f32.mrb[17].mxu1 }
 0x4f3   :  { %7049 = vmatprep.mubr.msk.f32.mxu1 %vm478_vm2, %v1902_v19 }
 0x4f4   :  { %7050 = vmatmul.mubr.msk.f32.vlgmr.msra.gmra.mrb[4].mxu1 %vm478_vm2, %v7043_v18  ;;  %v3398_v18 = vld [vmem:[%s9486_s6] sm:$0x3] }
 0x4f5   :  { %v7046_v22 = vpop.f32.mrb[18].mxu1  ;;  %7094 = vmatpush3.msra.mxu1 %v5930_v5 }
 0x4f6   :  { %v1912_v23 = vpop.f32.mrb[19].mxu1  ;;  %7139 = vmatprep.subr.mxu1 %v5939_v20 }
 0x4f7   :  { %7052 = vmatprep.mubr.msk.f32.mxu1 %vm478_vm2, %v1912_v23  ;;  %v6012_v23 = vld [vmem:[%s9486_s6 + $0xa] sm:$0x3] }
 0x4f8   :  { %7053 = vmatmul.mubr.msk.f32.gmra.mrb[6].mxu1 %vm478_vm2, %v7046_v22  ;;  %v6002_v22 = vld [vmem:[%s9486_s6 + $0x6] sm:$0x3] }
 0x4f9   :  { %7095 = vmatprep.mubr.msk.f32.mxu1 %vm478_vm2, %v8973_v58 }
 0x4fc   :  { %7096 = vmatmul.mubr.msk.f32.vlgmr.msra.gmra.mrb[4].mxu1 %vm478_vm2, %v8971_v57  ;;  %v5989_v57 = vld [vmem:[%s9484_s5] ss:$0 sm:$0xff] }
 0x4fd   :  { %7140 = vmatpush3.msra.mxu1 %v5939_v20  ;;  %7098 = vmatprep.mubr.msk.f32.mxu1 %vm478_vm2, %v2105_v8  ;;  %v5997_v20 = vld [vmem:[%s9486_s6 + $0x4] sm:$0x3] }
 0x4fe   :  { %8022 = vmatprep.subr.bf16.mxu1 %v8551_v34 }
 0x500   :  { %7099 = vmatmul.mubr.msk.f32.gmra.mrb[6].mxu1 %vm478_vm2, %v7092_v7 }
 0x501   :  { %7141 = vmatprep.mubr.msk.f32.mxu1 %vm478_vm2, %v2288_v10 }
 0x504   :  { %7142 = vmatmul.mubr.msk.f32.vlgmr.msra.gmra.mrb[4].mxu1 %vm478_vm2, %v7135_v9 }
 0x505   :  { %8024 = vmatpush3.bf16.msra.mxu1 %v8551_v34  ;;  %7144 = vmatprep.mubr.msk.f32.mxu1 %vm478_vm2, %v2298_v12 }
 0x506   :  { %8026 = vmatprep.subr.bf16.mxu1 %v8559_v43 }
 0x508   :  { %7145 = vmatmul.mubr.msk.f32.gmra.mrb[6].mxu1 %vm478_vm2, %v7138_v11 }
 0x509   :  { %8028 = vmatpush3.bf16.msra.mxu1 %v8559_v43  ;;  %7179 = vmatprep.mubr.f32.mxu1 %v5944_v24  ;;  %v6017_v24 = vld [vmem:[%s9486_s6 + $0xc] sm:$0x3] }
 0x50a   :  { %8030 = vmatprep.subr.bf16.mxu1 %v8567_v52 }
 0x50d   :  { %8032 = vmatpush3.bf16.msra.mxu1 %v8567_v52 }
 0x50e   :  { %8034 = vmatprep.subr.bf16.mxu1 %v8575_v61 }
 0x511   :  { %8036 = vmatpush3.bf16.msra.mxu1 %v8575_v61 }
 0x512   :  { %8038 = vmatprep.subr.bf16.mxu1 %v8583_v6 }
 0x515   :  { %8040 = vmatpush3.bf16.msra.mxu1 %v8583_v6 }
 0x516   :  { %8042 = vmatprep.subr.bf16.mxu1 %v8591_v15 }
 0x519   :  { %8044 = vmatpush3.bf16.msra.mxu1 %v8591_v15 }
 0x51a   :  { %8046 = vmatprep.subr.bf16.mxu1 %v8599_v25 }
 0x51d   :  { %8048 = vmatpush3.bf16.msra.mxu1 %v8599_v25 }
 0x51e   :  { %8050 = vmatprep.subr.bf16.mxu1 %v8605_v21 }
 0x521   :  { %8052 = vmatpush3.bf16.msra.mxu1 %v8605_v21 }
 0x522   :  { %7185 = vmatprep.subr.mxu1 %v5948_v26 }
 0x524   :  { %7180 = vmatmul.mubr.f32.vlgmr.msra.gmra.mrb[20].mxu1 %v5945_v27  ;;  %v6032_v27 = vld [vmem:[%s9486_s6 + $0x12] sm:$0x3] }
 0x525   :  { %7182 = vmatprep.mubr.f32.mxu1 %v5946_v28  ;;  %7186 = vmatpush3.msra.mxu1 %v5948_v26  ;;  %v6022_v26 = vld [vmem:[%s9486_s6 + $0xe] sm:$0x3]  ;;  %v6037_v28 = vld [vmem:[%s9486_s6 + $0x14] sm:$0x3] }
 0x526   :  { %7231 = vmatprep.subr.mxu1 %v5957_v30 }
 0x528   :  { %7183 = vmatmul.mubr.f32.gmra.mrb[22].mxu1 %v5947_v29  ;;  %v6042_v29 = vld [vmem:[%s9486_s6 + $0x16] sm:$0x3] }
 0x5f7   :  { %v7181_v42 = vpop.f32.mrb[20].mxu1 }
 0x5f8   :  { %v2481_v44 = vpop.f32.mrb[21].mxu1 }
 0x5f9   :  { %7187 = vmatprep.mubr.msk.f32.mxu1 %vm478_vm2, %v2481_v44 }
 0x5fa   :  { %7188 = vmatmul.mubr.msk.f32.vlgmr.msra.gmra.mrb[4].mxu1 %vm478_vm2, %v7181_v42  ;;  %v8206_v42 = vpack.c.bf16 %v6000_v41, %v5999_v40  ;;  %v6054_v41 = vld [vmem:[%s9485_s7 + $0xd0] sm:$0xff] }
 0x5fb   :  { %v7184_v46 = vpop.f32.mrb[22].mxu1  ;;  %7232 = vmatpush3.msra.mxu1 %v5957_v30  ;;  %v6052_v30 = vld [vmem:[%s9486_s6 + $0x1a] sm:$0x3] }
 0x5fc   :  { %v2491_v47 = vpop.f32.mrb[23].mxu1  ;;  %7277 = vmatprep.subr.mxu1 %v5966_v45 }
 0x5fd   :  { %7190 = vmatprep.mubr.msk.f32.mxu1 %vm478_vm2, %v2491_v47  ;;  %v6005_v47 = vld [vmem:[%s9485_s7 + $0x38] sm:$0xff] }
 0x5fe   :  { %7191 = vmatmul.mubr.msk.f32.gmra.mrb[6].mxu1 %vm478_vm2, %v7184_v46  ;;  %v6004_v46 = vld [vmem:[%s9485_s7 + $0x30] sm:$0xff] }
 0x5ff   :  { %7233 = vmatprep.mubr.msk.f32.mxu1 %vm478_vm2, %v9025_v17  ;;  %v5991_v17 = vld [vmem:[%s9486_s6 + $0x2] sm:$0x3] }
 0x602   :  { %7234 = vmatmul.mubr.msk.f32.vlgmr.msra.gmra.mrb[4].mxu1 %vm478_vm2, %v9023_v16  ;;  %v5994_v16 = vld [vmem:[%s9485_s7 + $0x18] sm:$0xff] }
 0x603   :  { %7278 = vmatpush3.msra.mxu1 %v5966_v45  ;;  %7236 = vmatprep.mubr.msk.f32.mxu1 %vm478_vm2, %v2684_v32  ;;  %v8194_v19 = vpack.c.bf16 %v5994_v16, %v5993_v14  ;;  %v3473_v32 = vld [vmem:[%s9485_s7] sm:$0xff] }
 0x604   :  { %8118 = vmatprep.subr.bf16.mxu1 %v8551_v34 }
 0x606   :  { %7237 = vmatmul.mubr.msk.f32.gmra.mrb[6].mxu1 %vm478_vm2, %v7230_v31  ;;  %v6057_v31 = vld [vmem:[%s9486_s6 + $0x1c] sm:$0x3] }
 0x607   :  { %7279 = vmatprep.mubr.msk.f32.mxu1 %vm478_vm2, %v2867_v35 }
 0x60a   :  { %7280 = vmatmul.mubr.msk.f32.vlgmr.msra.gmra.mrb[4].mxu1 %vm478_vm2, %v7273_v33  ;;  %v3474_v33 = vld [vmem:[%s9485_s7 + $0x8] sm:$0xff] }
 0x60b   :  { %8120 = vmatpush3.bf16.msra.mxu1 %v8551_v34  ;;  %7282 = vmatprep.mubr.msk.f32.mxu1 %vm478_vm2, %v2877_v37  ;;  %v5975_v34 = vld [vmem:[%s9483_s4 + $0x70] sm:$0xff]  ;;  %v8197_v35 = vpack.c.bf16 %v3474_v33, %v3473_v32  ;;  %v6049_v32 = vld [vmem:[%s9485_s7 + $0xc0] sm:$0xff]  ;;  %v6050_v33 = vld [vmem:[%s9485_s7 + $0xc8] sm:$0xff] }
 0x60c   :  { %8122 = vmatprep.subr.bf16.mxu1 %v8559_v43 }
 0x60e   :  { %7283 = vmatmul.mubr.msk.f32.gmra.mrb[6].mxu1 %vm478_vm2, %v7276_v36 }
 0x60f   :  { %8124 = vmatpush3.bf16.msra.mxu1 %v8559_v43  ;;  %7317 = vmatprep.mubr.f32.mxu1 %v5971_v48  ;;  %v5972_v43 = vld [vmem:[%s9481_s3 + $0x1c8] sm:$0xff]  ;;  %v8215_v48 = vpack.c.bf16 %v6005_v47, %v6004_v46  ;;  %v6059_v47 = vld [vmem:[%s9485_s7 + $0xe0] sm:$0xff] }
 0x610   :  { %8126 = vmatprep.subr.bf16.mxu1 %v8567_v52 }
 0x613   :  { %8128 = vmatpush3.bf16.msra.mxu1 %v8567_v52  ;;  %v5973_v52 = vld [vmem:[%s9481_s3 + $0x1d0] sm:$0xff] }
 0x614   :  { %8130 = vmatprep.subr.bf16.mxu1 %v8575_v61 }
 0x617   :  { %8132 = vmatpush3.bf16.msra.mxu1 %v8575_v61  ;;  %v5974_v61 = vld [vmem:[%s9481_s3 + $0x1d8] sm:$0xff] }
 0x618   :  { %8134 = vmatprep.subr.bf16.mxu1 %v8583_v6 }
 0x61b   :  { %8136 = vmatpush3.bf16.msra.mxu1 %v8583_v6  ;;  %v5984_v6 = vld [vmem:[%s9483_s4 + $0x78] sm:$0xff] }
 0x61c   :  { %8138 = vmatprep.subr.bf16.mxu1 %v8591_v15 }
 0x61f   :  { %8140 = vmatpush3.bf16.msra.mxu1 %v8591_v15  ;;  %v7365_v15 = vpop.f32.mrb[52].mxu0 }
 0x620   :  { %8142 = vmatprep.subr.bf16.mxu1 %v8599_v25 }
 0x623   :  { %8144 = vmatpush3.bf16.msra.mxu1 %v8599_v25  ;;  %v3253_v25 = vpop.f32.mrb[53].mxu0 }
 0x624   :  { %8146 = vmatprep.subr.bf16.mxu1 %v8605_v21 }
 0x627   :  { %8148 = vmatpush3.bf16.msra.mxu1 %v8605_v21  ;;  %v7368_v21 = vpop.f32.mrb[54].mxu0 }
 0x628   :  { %7323 = vmatprep.subr.mxu1 %v5975_v34  ;;  %v3263_v49 = vpop.f32.mrb[55].mxu0 }
 0x62a   :  { %7318 = vmatmul.mubr.f32.vlgmr.msra.gmra.mrb[24].mxu1 %v5972_v43 }
 0x62b   :  { %7320 = vmatprep.mubr.f32.mxu1 %v5973_v52  ;;  %7324 = vmatpush3.msra.mxu1 %v5975_v34  ;;  %v6009_v52 = vld [vmem:[%s9485_s7 + $0x40] sm:$0xff] }
 0x62c   :  { %7369 = vmatprep.subr.mxu1 %v5984_v6 }
 0x62e   :  { %7321 = vmatmul.mubr.f32.gmra.mrb[26].mxu1 %v5974_v61  ;;  %v6010_v61 = vld [vmem:[%s9485_s7 + $0x48] sm:$0xff] }
 0x6fd   :  { %v7319_v50 = vpop.f32.mrb[24].mxu1 }
 0x6fe   :  { %v3060_v51 = vpop.f32.mrb[25].mxu1 }
 0x6ff   :  { %7325 = vmatprep.mubr.msk.f32.mxu1 %vm478_vm2, %v3060_v51 }
 0x700   :  { %7326 = vmatmul.mubr.msk.f32.vlgmr.msra.gmra.mrb[4].mxu1 %vm478_vm2, %v7319_v50 }
 0x701   :  { %v7322_v53 = vpop.f32.mrb[26].mxu1  ;;  %7370 = vmatpush3.msra.mxu1 %v5984_v6  ;;  %v6007_v6 = vld [vmem:[%s9486_s6 + $0x8] sm:$0x3] }
 0x702   :  { %v3070_v54 = vpop.f32.mrb[27].mxu1  ;;  %8181 = vmatprep.subr.bf16.mxu1 %v8418_v55 }
 0x703   :  { %7328 = vmatprep.mubr.msk.f32.mxu1 %vm478_vm2, %v3070_v54  ;;  %v6014_v54 = vld [vmem:[%s9485_s7 + $0x50] sm:$0xff] }
 0x704   :  { %7329 = vmatmul.mubr.msk.f32.gmra.mrb[6].mxu1 %vm478_vm2, %v7322_v53 }
 0x705   :  { %7371 = vmatprep.mubr.msk.f32.mxu1 %vm478_vm2, %v3253_v25 }
 0x708   :  { %7372 = vmatmul.mubr.msk.f32.vlgmr.msra.gmra.mrb[4].mxu1 %vm478_vm2, %v7365_v15  ;;  %v8224_v15 = vpack.c.bf16 %v6010_v61, %v6009_v52  ;;  %v6065_v52 = vld [vmem:[%s9485_s7 + $0xf8] sm:$0xff] }
 0x709   :  { %7374 = vmatprep.mubr.msk.f32.mxu1 %vm478_vm2, %v3263_v49 }
 0x70c   :  { %7375 = vmatmul.mubr.msk.f32.gmra.mrb[6].mxu1 %vm478_vm2, %v7368_v21 }
 0x70d   :  { %7385 = vmatprep.mubr.msk.f32.mxu1 %vm8419_vm3, %v8420_v56 }
 0x7db   :  { %v7373_v58 = vpop.f32.mrb[4].mxu1 }
 0x7dc   :  { %v3383_v59 = vadd.f32 %v7373_v58, %v5989_v57  ;;  %v3352_v60 = vpop.f32.mrb[5].mxu1 }
 0x7dd   :  { %v3382_v62 = vadd.f32 %v5989_v57, %v3352_v60 }
 0x7de   :  { %vm3387_vm4 = vcmp.gt.f32.partialorder %v3383_v59, 0.0  ;;  %v3391_v63 = vmul.f32 0.01, %v3383_v59 }
 0x7df   :  { %vm3386_vm5 = vcmp.gt.f32.partialorder %v3382_v62, 0.0  ;;  %v3390_v0 = vmul.f32 0.01, %v3382_v62  ;;  %v7376_v1 = vpop.f32.mrb[6].mxu1 }
 0x7e0   :  { %v3395_v2 = vsel %vm3387_vm4, %v3383_v59, %v3391_v63  ;;  %v3385_v3 = vadd.f32 %v7376_v1, %v5989_v57  ;;  %v3362_v4 = vpop.f32.mrb[7].mxu1  ;;  %v6020_v63 = vld [vmem:[%s9485_s7 + $0x68] sm:$0xff]  ;;  %v6024_v1 = vld [vmem:[%s9485_s7 + $0x70] sm:$0xff] }
 0x7e1   :  { %v3394_v5 = vsel %vm3386_vm5, %v3382_v62, %v3390_v0  ;;  %v3384_v7 = vadd.f32 %v5989_v57, %v3362_v4  ;;  %v6015_v57 = vld [vmem:[%s9485_s7 + $0x58] sm:$0xff]  ;;  %v6019_v62 = vld [vmem:[%s9485_s7 + $0x60] sm:$0xff] }
 0x7e2   :  { %v9158_v8 = vpack.c.bf16 %v3395_v2, %v3394_v5  ;;  %vm3389_vm6 = vcmp.gt.f32.partialorder %v3385_v3, 0.0  ;;  %v3393_v9 = vmul.f32 0.01, %v3385_v3  ;;  %v8233_v58 = vpack.c.bf16 %v6015_v57, %v6014_v54  ;;  %v6025_v2 = vld [vmem:[%s9485_s7 + $0x78] sm:$0xff]  ;;  %v6029_v4 = vld [vmem:[%s9485_s7 + $0x80] sm:$0xff]  ;;  %v6030_v5 = vld [vmem:[%s9485_s7 + $0x88] sm:$0xff] }
 0x7e3   :  { %vm3388_vm7 = vcmp.gt.f32.partialorder %v3384_v7, 0.0  ;;  %v3392_v10 = vmul.f32 0.01, %v3384_v7  ;;  %v8242_v0 = vpack.c.bf16 %v6020_v63, %v6019_v62 }
 0x7e4   :  { %v3397_v11 = vsel %vm3389_vm6, %v3385_v3, %v3393_v9  ;;  %8183 = vmatpush3.bf16.msra.mxu1 %v9158_v8  ;;  %8189 = vmatpush3.bf16.msra.mxu0 %v9158_v8  ;;  %v8251_v3 = vpack.c.bf16 %v6025_v2, %v6024_v1  ;;  %v8260_v9 = vpack.c.bf16 %v6030_v5, %v6029_v4 }
 0x7e5   :  { %v3396_v12 = vsel %vm3388_vm7, %v3384_v7, %v3392_v10  ;;  %8184 = vmatprep.subr.bf16.mxu1 %v8418_v55  ;;  %8190 = vmatprep.subr.bf16.mxu0 %v8418_v55  ;;  %v6027_v7 = vld [vmem:[%s9486_s6 + $0x10] sm:$0x3] }
 0x7e6   :  { %v9164_v13 = vpack.c.bf16 %v3397_v11, %v3396_v12 }
 0x7e8   :  { %8186 = vmatpush3.bf16.msra.mxu1 %v9164_v13  ;;  %8192 = vmatpush3.bf16.msra.mxu0 %v9164_v13 }
 0x7e9   :  { %8199 = vmatprep.subr.bf16.mxu0 %v8418_v55  ;;  %8193 = vmatprep.subr.bf16.mxu1 %v8418_v55 }
 0x7eb   :  { %7397 = vmatmul.mubr.msk.f32.vlgmr.msra.gmra.mrb[56].mxu0 %vm3399_vm8, %v5991_v17  ;;  %7386 = vmatmul.mubr.msk.f32.vlgmr.msra.gmra.mrb[28].mxu1 %vm3399_vm8, %v3398_v18  ;;  %v6062_v18 = vld [vmem:[%s9486_s6 + $0x1e] sm:$0x3] }
 0x7ec   :  { %8201 = vmatpush3.bf16.msra.mxu0 %v9158_v8  ;;  %7421 = vmatprep.mubr.msk.f32.mxu0 %vm8419_vm3, %v8420_v56 }
 0x7ed   :  { %8202 = vmatprep.subr.bf16.mxu0 %v8418_v55  ;;  %8195 = vmatpush3.bf16.msra.mxu1 %v8194_v19  ;;  %v6034_v19 = vld [vmem:[%s9485_s7 + $0x90] sm:$0xff] }
 0x7ee   :  { %7403 = vmatprep.mubr.msk.f32.mxu1 %vm8419_vm3, %v8420_v56  ;;  %8196 = vmatprep.subr.bf16.mxu1 %v8418_v55 }
 0x7f0   :  { %8204 = vmatpush3.bf16.msra.mxu0 %v9164_v13 }
 0x7f1   :  { %8208 = vmatprep.subr.bf16.mxu0 %v8418_v55 }
 0x7f3   :  { %7422 = vmatmul.mubr.msk.f32.vlgmr.msra.gmra.mrb[58].mxu0 %vm3399_vm8, %v5997_v20  ;;  %v6035_v20 = vld [vmem:[%s9485_s7 + $0x98] sm:$0xff] }
 0x7f4   :  { %8210 = vmatpush3.bf16.msra.mxu0 %v9158_v8  ;;  %7439 = vmatprep.mubr.msk.f32.mxu0 %vm8419_vm3, %v8420_v56 }
 0x7f5   :  { %8211 = vmatprep.subr.bf16.mxu0 %v8418_v55 }
 0x7f8   :  { %8213 = vmatpush3.bf16.msra.mxu0 %v9164_v13 }
 0x7f9   :  { %8226 = vmatprep.subr.bf16.mxu0 %v8418_v55 }
 0x7fb   :  { %7440 = vmatmul.mubr.msk.f32.vlgmr.msra.gmra.mrb[60].mxu0 %vm3399_vm8, %v6002_v22  ;;  %v8269_v22 = vpack.c.bf16 %v6035_v20, %v6034_v19 }
 0x7fc   :  { %8228 = vmatpush3.bf16.msra.mxu0 %v9158_v8  ;;  %7475 = vmatprep.mubr.msk.f32.mxu0 %vm8419_vm3, %v8420_v56 }
 0x7fd   :  { %8229 = vmatprep.subr.bf16.mxu0 %v8418_v55 }
 0x800   :  { %8231 = vmatpush3.bf16.msra.mxu0 %v9164_v13 }
 0x801   :  { %8235 = vmatprep.subr.bf16.mxu0 %v8418_v55 }
 0x803   :  { %7476 = vmatmul.mubr.msk.f32.vlgmr.msra.gmra.mrb[62].mxu0 %vm3399_vm8, %v6012_v23 }
 0x804   :  { %8237 = vmatpush3.bf16.msra.mxu0 %v9158_v8  ;;  %7493 = vmatprep.mubr.msk.f32.mxu0 %vm8419_vm3, %v8420_v56 }
 0x805   :  { %8238 = vmatprep.subr.bf16.mxu0 %v8418_v55 }
 0x808   :  { %8240 = vmatpush3.bf16.msra.mxu0 %v9164_v13 }
 0x809   :  { %8244 = vmatprep.subr.bf16.mxu0 %v8418_v55 }
 0x80b   :  { %7494 = vmatmul.mubr.msk.f32.vlgmr.msra.gmra.mrb[64].mxu0 %vm3399_vm8, %v6017_v24 }
 0x80c   :  { %8246 = vmatpush3.bf16.msra.mxu0 %v9158_v8  ;;  %7511 = vmatprep.mubr.msk.f32.mxu0 %vm8419_vm3, %v8420_v56 }
 0x80d   :  { %8247 = vmatprep.subr.bf16.mxu0 %v8418_v55 }
 0x810   :  { %8249 = vmatpush3.bf16.msra.mxu0 %v9164_v13 }
 0x811   :  { %8262 = vmatprep.subr.bf16.mxu0 %v8418_v55 }
 0x813   :  { %7512 = vmatmul.mubr.msk.f32.vlgmr.msra.gmra.mrb[66].mxu0 %vm3399_vm8, %v6022_v26  ;;  %v6039_v26 = vld [vmem:[%s9485_s7 + $0xa0] sm:$0xff] }
 0x814   :  { %8264 = vmatpush3.bf16.msra.mxu0 %v9158_v8  ;;  %7547 = vmatprep.mubr.msk.f32.mxu0 %vm8419_vm3, %v8420_v56 }
 0x815   :  { %8265 = vmatprep.subr.bf16.mxu0 %v8418_v55 }
 0x818   :  { %8267 = vmatpush3.bf16.msra.mxu0 %v9164_v13 }
 0x819   :  { %8271 = vmatprep.subr.bf16.mxu0 %v8418_v55 }
 0x81b   :  { %7548 = vmatmul.mubr.msk.f32.vlgmr.msra.gmra.mrb[68].mxu0 %vm3399_vm8, %v6032_v27  ;;  %v6040_v27 = vld [vmem:[%s9485_s7 + $0xa8] sm:$0xff] }
 0x81c   :  { %8273 = vmatpush3.bf16.msra.mxu0 %v9158_v8  ;;  %7565 = vmatprep.mubr.msk.f32.mxu0 %vm8419_vm3, %v8420_v56 }
 0x81d   :  { %8274 = vmatprep.subr.bf16.mxu0 %v8418_v55 }
 0x820   :  { %8276 = vmatpush3.bf16.msra.mxu0 %v9164_v13 }
 0x821   :  { %8280 = vmatprep.subr.bf16.mxu0 %v8418_v55 }
 0x823   :  { %7566 = vmatmul.mubr.msk.f32.vlgmr.msra.gmra.mrb[70].mxu0 %vm3399_vm8, %v6037_v28  ;;  %v8278_v28 = vpack.c.bf16 %v6040_v27, %v6039_v26 }
 0x824   :  { %8282 = vmatpush3.bf16.msra.mxu0 %v9158_v8  ;;  %7583 = vmatprep.mubr.msk.f32.mxu0 %vm8419_vm3, %v8420_v56 }
 0x825   :  { %8283 = vmatprep.subr.bf16.mxu0 %v8418_v55 }
 0x828   :  { %8285 = vmatpush3.bf16.msra.mxu0 %v9164_v13 }
 0x829   :  { %8298 = vmatprep.subr.bf16.mxu0 %v8418_v55 }
 0x82b   :  { %7584 = vmatmul.mubr.msk.f32.vlgmr.msra.gmra.mrb[72].mxu0 %vm3399_vm8, %v6042_v29  ;;  %v6044_v29 = vld [vmem:[%s9485_s7 + $0xb0] sm:$0xff] }
 0x82c   :  { %8300 = vmatpush3.bf16.msra.mxu0 %v9158_v8  ;;  %7619 = vmatprep.mubr.msk.f32.mxu0 %vm8419_vm3, %v8420_v56 }
 0x82d   :  { %8301 = vmatprep.subr.bf16.mxu0 %v8418_v55 }
 0x830   :  { %8303 = vmatpush3.bf16.msra.mxu0 %v9164_v13 }
 0x831   :  { %8307 = vmatprep.subr.bf16.mxu0 %v8418_v55 }
 0x833   :  { %7620 = vmatmul.mubr.msk.f32.vlgmr.msra.gmra.mrb[74].mxu0 %vm3399_vm8, %v6052_v30  ;;  %v6045_v30 = vld [vmem:[%s9485_s7 + $0xb8] sm:$0xff] }
 0x834   :  { %8309 = vmatpush3.bf16.msra.mxu0 %v9158_v8  ;;  %7637 = vmatprep.mubr.msk.f32.mxu0 %vm8419_vm3, %v8420_v56 }
 0x835   :  { %8310 = vmatprep.subr.bf16.mxu0 %v8418_v55 }
 0x838   :  { %8312 = vmatpush3.bf16.msra.mxu0 %v9164_v13 }
 0x839   :  { %8316 = vmatprep.subr.bf16.mxu0 %v8418_v55 }
 0x83b   :  { %7638 = vmatmul.mubr.msk.f32.vlgmr.msra.gmra.mrb[76].mxu0 %vm3399_vm8, %v6057_v31  ;;  %v8287_v31 = vpack.c.bf16 %v6045_v30, %v6044_v29 }
 0x83c   :  { %8318 = vmatpush3.bf16.msra.mxu0 %v9158_v8  ;;  %7655 = vmatprep.mubr.msk.f32.mxu0 %vm8419_vm3, %v8420_v56 }
 0x83d   :  { %8319 = vmatprep.subr.bf16.mxu0 %v8418_v55 }
 0x840   :  { %8321 = vmatpush3.bf16.msra.mxu0 %v9164_v13 }
 0x843   :  { %7656 = vmatmul.mubr.msk.f32.vlgmr.msra.gmra.mrb[78].mxu0 %vm3399_vm8, %v6062_v18 }
 0x8be   :  { %v3546_v36 = vpop.f32.mrb[56].mxu0  ;;  %v3469_v37 = vpop.f32.mrb[28].mxu1 }
 0x8bf   :  { %v7398_v38 = vpop.f32.mrb[57].mxu0  ;;  %7404 = vmatmul.mubr.msk.f32.vlgmr.msra.gmra.mrb[30].mxu1 %vm54_vm0, %v3546_v36  ;;  %v7387_v39 = vpop.f32.mrb[29].mxu1 }
 0x8c0   :  { %8198 = vmatpush3.bf16.msra.mxu1 %v8197_v35  ;;  %7410 = vmatprep.mubr.msk.f32.mxu1 %vm8419_vm3, %v8420_v56  ;;  %v6047_v35 = vld [vmem:[%s9486_s6 + $0x18] sm:$0x3] }
 0x8c1   :  { %8205 = vmatprep.subr.bf16.mxu1 %v8418_v55 }
 0x8c6   :  { %v3770_v44 = vpop.f32.mrb[58].mxu0 }
 0x8c7   :  { %7411 = vmatmul.mubr.msk.f32.vlgmr.msra.gmra.mrb[30].mxu1 %vm54_vm0, %v3469_v37  ;;  %v7423_v45 = vpop.f32.mrb[59].mxu0 }
 0x8c8   :  { %8207 = vmatpush3.bf16.msra.mxu1 %v8206_v42  ;;  %7428 = vmatprep.mubr.msk.f32.mxu1 %vm8419_vm3, %v8420_v56  ;;  %v6055_v42 = vld [vmem:[%s9485_s7 + $0xd8] sm:$0xff] }
 0x8c9   :  { %8214 = vmatprep.subr.bf16.mxu1 %v8418_v55 }
 0x8ce   :  { %v3922_v34 = vpop.f32.mrb[60].mxu0 }
 0x8cf   :  { %7429 = vmatmul.mubr.msk.f32.vlgmr.msra.gmra.mrb[30].mxu1 %vm54_vm0, %v3770_v44  ;;  %v7441_v43 = vpop.f32.mrb[61].mxu0  ;;  %v8305_v44 = vpack.c.bf16 %v6055_v42, %v6054_v41 }
 0x8d0   :  { %8216 = vmatpush3.bf16.msra.mxu1 %v8215_v48  ;;  %7446 = vmatprep.mubr.msk.f32.mxu1 %vm8419_vm3, %v8420_v56  ;;  %v6060_v48 = vld [vmem:[%s9485_s7 + $0xe8] sm:$0xff]  ;;  %v6064_v43 = vld [vmem:[%s9485_s7 + $0xf0] sm:$0xff] }
 0x8d1   :  { %8217 = vmatprep.subr.bf16.mxu1 %v8418_v55  ;;  %v8323_v61 = vpack.c.bf16 %v6065_v52, %v6064_v43 }
 0x8d6   :  { %v4226_v25 = vpop.f32.mrb[62].mxu0 }
 0x8d7   :  { %7447 = vmatmul.mubr.msk.f32.vlgmr.msra.gmra.mrb[30].mxu1 %vm54_vm0, %v3922_v34  ;;  %v7477_v21 = vpop.f32.mrb[63].mxu0  ;;  %v8314_v34 = vpack.c.bf16 %v6060_v48, %v6059_v47 }
 0x8d8   :  { %8219 = vmatpush3.bf16.msra.mxu1 %v9158_v8  ;;  %7457 = vmatprep.mubr.msk.f32.mxu1 %vm8419_vm3, %v8420_v56 }
 0x8d9   :  { %8220 = vmatprep.subr.bf16.mxu1 %v8418_v55 }
 0x8dc   :  { %8222 = vmatpush3.bf16.msra.mxu1 %v9164_v13 }
 0x8dd   :  { %8223 = vmatprep.subr.bf16.mxu1 %v8418_v55 }
 0x8de   :  { %v4378_v49 = vpop.f32.mrb[64].mxu0 }
 0x8df   :  { %7458 = vmatmul.mubr.msk.f32.vlgmr.msra.gmra.mrb[32].mxu1 %vm3399_vm8, %v6007_v6  ;;  %v7495_v50 = vpop.f32.mrb[65].mxu0 }
 0x8e0   :  { %8225 = vmatpush3.bf16.msra.mxu1 %v8224_v15  ;;  %7464 = vmatprep.mubr.msk.f32.mxu1 %vm8419_vm3, %v8420_v56 }
 0x8e1   :  { %8232 = vmatprep.subr.bf16.mxu1 %v8418_v55 }
 0x8e6   :  { %v4530_v51 = vpop.f32.mrb[66].mxu0 }
 0x8e7   :  { %v7513_v53 = vpop.f32.mrb[67].mxu0 }
 0x8ee   :  { %v4834_v10 = vpop.f32.mrb[68].mxu0 }
 0x8ef   :  { %v7549_v11 = vpop.f32.mrb[69].mxu0 }
 0x8f6   :  { %v4986_v12 = vpop.f32.mrb[70].mxu0 }
 0x8f7   :  { %v7567_v14 = vpop.f32.mrb[71].mxu0 }
 0x8fe   :  { %v5138_v16 = vpop.f32.mrb[72].mxu0 }
 0x8ff   :  { %v7585_v17 = vpop.f32.mrb[73].mxu0 }
 0x906   :  { %v5442_v36 = vpop.f32.mrb[74].mxu0 }
 0x907   :  { %v7621_v37 = vpop.f32.mrb[75].mxu0 }
 0x90e   :  { %v5594_v38 = vpop.f32.mrb[76].mxu0 }
 0x90f   :  { %v7639_v39 = vpop.f32.mrb[77].mxu0 }
 0x9b2   :  { %v4074_v59 = vpop.f32.mrb[32].mxu1 }
 0x9b3   :  { %v7459_v60 = vpop.f32.mrb[33].mxu1  ;;  %7465 = vmatmul.mubr.msk.f32.vlgmr.msra.gmra.mrb[30].mxu1 %vm54_vm0, %v4074_v59 }
 0x9b4   :  { %8234 = vmatpush3.bf16.msra.mxu1 %v8233_v58  ;;  %7482 = vmatprep.mubr.msk.f32.mxu1 %vm8419_vm3, %v8420_v56 }
 0x9b5   :  { %8241 = vmatprep.subr.bf16.mxu1 %v8418_v55 }
 0x9bb   :  { %7483 = vmatmul.mubr.msk.f32.vlgmr.msra.gmra.mrb[30].mxu1 %vm54_vm0, %v4226_v25 }
 0x9bc   :  { %8243 = vmatpush3.bf16.msra.mxu1 %v8242_v0  ;;  %7500 = vmatprep.mubr.msk.f32.mxu1 %vm8419_vm3, %v8420_v56 }
 0x9bd   :  { %8250 = vmatprep.subr.bf16.mxu1 %v8418_v55 }
 0x9c3   :  { %7501 = vmatmul.mubr.msk.f32.vlgmr.msra.gmra.mrb[30].mxu1 %vm54_vm0, %v4378_v49 }
 0x9c4   :  { %8252 = vmatpush3.bf16.msra.mxu1 %v8251_v3  ;;  %7518 = vmatprep.mubr.msk.f32.mxu1 %vm8419_vm3, %v8420_v56 }
 0x9c5   :  { %8253 = vmatprep.subr.bf16.mxu1 %v8418_v55 }
 0x9cb   :  { %7519 = vmatmul.mubr.msk.f32.vlgmr.msra.gmra.mrb[30].mxu1 %vm54_vm0, %v4530_v51 }
 0x9cc   :  { %8255 = vmatpush3.bf16.msra.mxu1 %v9158_v8  ;;  %7529 = vmatprep.mubr.msk.f32.mxu1 %vm8419_vm3, %v8420_v56 }
 0x9cd   :  { %8256 = vmatprep.subr.bf16.mxu1 %v8418_v55 }
 0x9d0   :  { %8258 = vmatpush3.bf16.msra.mxu1 %v9164_v13 }
 0x9d1   :  { %8259 = vmatprep.subr.bf16.mxu1 %v8418_v55 }
 0x9d3   :  { %7530 = vmatmul.mubr.msk.f32.vlgmr.msra.gmra.mrb[34].mxu1 %vm3399_vm8, %v6027_v7 }
 0x9d4   :  { %8261 = vmatpush3.bf16.msra.mxu1 %v8260_v9  ;;  %7536 = vmatprep.mubr.msk.f32.mxu1 %vm8419_vm3, %v8420_v56 }
 0x9d5   :  { %8268 = vmatprep.subr.bf16.mxu1 %v8418_v55 }
 0xaa6   :  { %v4682_v23 = vpop.f32.mrb[34].mxu1 }
 0xaa7   :  { %v7531_v24 = vpop.f32.mrb[35].mxu1  ;;  %7537 = vmatmul.mubr.msk.f32.vlgmr.msra.gmra.mrb[30].mxu1 %vm54_vm0, %v4682_v23 }
 0xaa8   :  { %8270 = vmatpush3.bf16.msra.mxu1 %v8269_v22  ;;  %7554 = vmatprep.mubr.msk.f32.mxu1 %vm8419_vm3, %v8420_v56 }
 0xaa9   :  { %8277 = vmatprep.subr.bf16.mxu1 %v8418_v55 }
 0xaaf   :  { %7555 = vmatmul.mubr.msk.f32.vlgmr.msra.gmra.mrb[30].mxu1 %vm54_vm0, %v4834_v10 }
 0xab0   :  { %8279 = vmatpush3.bf16.msra.mxu1 %v8278_v28  ;;  %7572 = vmatprep.mubr.msk.f32.mxu1 %vm8419_vm3, %v8420_v56 }
 0xab1   :  { %8286 = vmatprep.subr.bf16.mxu1 %v8418_v55 }
 0xab7   :  { %7573 = vmatmul.mubr.msk.f32.vlgmr.msra.gmra.mrb[30].mxu1 %vm54_vm0, %v4986_v12 }
 0xab8   :  { %8288 = vmatpush3.bf16.msra.mxu1 %v8287_v31  ;;  %7590 = vmatprep.mubr.msk.f32.mxu1 %vm8419_vm3, %v8420_v56 }
 0xab9   :  { %8289 = vmatprep.subr.bf16.mxu1 %v8418_v55 }
 0xabf   :  { %7591 = vmatmul.mubr.msk.f32.vlgmr.msra.gmra.mrb[30].mxu1 %vm54_vm0, %v5138_v16 }
 0xac0   :  { %8291 = vmatpush3.bf16.msra.mxu1 %v9158_v8  ;;  %7601 = vmatprep.mubr.msk.f32.mxu1 %vm8419_vm3, %v8420_v56  ;;  %v8296_v8 = vpack.c.bf16 %v6050_v33, %v6049_v32 }
 0xac1   :  { %8292 = vmatprep.subr.bf16.mxu1 %v8418_v55 }
 0xac4   :  { %8294 = vmatpush3.bf16.msra.mxu1 %v9164_v13  ;;  %v5746_v13 = vpop.f32.mrb[78].mxu0 }
 0xac5   :  { %8295 = vmatprep.subr.bf16.mxu1 %v8418_v55  ;;  %v7657_v40 = vpop.f32.mrb[79].mxu0 }
 0xac7   :  { %7602 = vmatmul.mubr.msk.f32.vlgmr.msra.gmra.mrb[36].mxu1 %vm3399_vm8, %v6047_v35 }
 0xac8   :  { %8297 = vmatpush3.bf16.msra.mxu1 %v8296_v8  ;;  %7608 = vmatprep.mubr.msk.f32.mxu1 %vm8419_vm3, %v8420_v56 }
 0xac9   :  { %8304 = vmatprep.subr.bf16.mxu1 %v8418_v55 }
 0xb9a   :  { %v5290_v45 = vpop.f32.mrb[36].mxu1 }
 0xb9b   :  { %v7603_v46 = vpop.f32.mrb[37].mxu1  ;;  %7609 = vmatmul.mubr.msk.f32.vlgmr.msra.gmra.mrb[30].mxu1 %vm54_vm0, %v5290_v45 }
 0xb9c   :  { %8306 = vmatpush3.bf16.msra.mxu1 %v8305_v44  ;;  %7626 = vmatprep.mubr.msk.f32.mxu1 %vm8419_vm3, %v8420_v56 }
 0xb9d   :  { %8313 = vmatprep.subr.bf16.mxu1 %v8418_v55 }
 0xba3   :  { %7627 = vmatmul.mubr.msk.f32.vlgmr.msra.gmra.mrb[30].mxu1 %vm54_vm0, %v5442_v36 }
 0xba4   :  { %8315 = vmatpush3.bf16.msra.mxu1 %v8314_v34  ;;  %7644 = vmatprep.mubr.msk.f32.mxu1 %vm8419_vm3, %v8420_v56 }
 0xba5   :  { %8322 = vmatprep.subr.bf16.mxu1 %v8418_v55 }
 0xbab   :  { %7645 = vmatmul.mubr.msk.f32.vlgmr.msra.gmra.mrb[30].mxu1 %vm54_vm0, %v5594_v38 }
 0xbac   :  { %8324 = vmatpush3.bf16.msra.mxu1 %v8323_v61  ;;  %7662 = vmatprep.mubr.msk.f32.mxu1 %vm8419_vm3, %v8420_v56 }
 0xbb3   :  { %7663 = vmatmul.mubr.msk.f32.vlgmr.msra.gmra.mrb[30].mxu1 %vm54_vm0, %v5746_v13 }
 0xc86   :  { %v5822_v6 = vpop.f32.mrb[30].mxu1 }
 0xc87   :  { %5828 = vst.msk [vmem:[%s9487_s8] sm:$0x3] %vm5827_vm9, %v5822_v6  ;;  %v7664_v55 = vpop.f32.mrb[31].mxu1 }

</bundles_post_ra>
